<compile_context>
chip_gen: v7x
topology: tpu7x:2x2x1
jax: 0.10.0
libtpu: 0.0.40
codegen_flags: <defaults>
</compile_context>

<pallas_src>
import functools

import jax
import jax.numpy as jnp
from jax.experimental import pallas as pl
from jax.experimental.pallas import tpu as pltpu


_VMEM_LIMIT = 48 * 1024 * 1024  # conservative: fits v7x (64 MiB), ample on v5e/v6e


# --------------------------------------------------------------------------
# Fused Conv3x3('same') + bias + ReLU (+ optional fused 2x2 max-pool)
# --------------------------------------------------------------------------
def _conv3x3_kernel(x_ref, w_ref, b_ref, o_ref, *, fuse_pool):
    """x_ref: (1, H, W, Cin) f32.  w_ref: (9*Cin, tco) bf16.
    b_ref: (1, tco) f32.  o_ref: (1, H[/2], W[/2], tco) f32."""
    _, H, W, Cin = x_ref.shape
    tco = o_ref.shape[-1]

    # Cast activations to bf16 once (bf16 MXU path, halves VMEM bytes).
    x = x_ref[0].astype(jnp.bfloat16)                         # (H, W, Cin)

    # 1-pixel zero halo built in VMEM (no extra HBM pad pass per layer).
    zc = jnp.zeros((H, 1, Cin), jnp.bfloat16)
    xp = jnp.concatenate([zc, x, zc], axis=1)                 # (H, W+2, Cin)
    zr = jnp.zeros((1, W + 2, Cin), jnp.bfloat16)
    xp = jnp.concatenate([zr, xp, zr], axis=0)                # (H+2, W+2, Cin)

    # im2col: fold all 9 taps into the contraction dim -> one MXU matmul
    # with K = 9*Cin instead of 9 tiny matmuls with K = Cin.
    taps = [xp[dy:dy + H, dx:dx + W, :]
            for dy in range(3) for dx in range(3)]
    patches = jnp.concatenate(taps, axis=-1)                  # (H, W, 9*Cin)
    patches = patches.reshape(H * W, 9 * Cin)

    acc = jnp.dot(patches, w_ref[...],
                  preferred_element_type=jnp.float32)         # (H*W, tco) f32
    y = jnp.maximum(acc + b_ref[...], 0.0)                    # bias + ReLU, f32
    y = y.reshape(H, W, tco)

    if fuse_pool:
        # Fused MaxPool2d(2): pool the accumulator before storing.
        y = y.reshape(H, W // 2, 2, tco)
        y = jnp.max(y, axis=2)
        y = y.reshape(H // 2, 2, W // 2, tco)
        y = jnp.max(y, axis=1)

    o_ref[0] = y.astype(o_ref.dtype)


def conv3x3_relu(x, w2d, b, fuse_pool):
    """x: (N, H, W, Cin) f32; w2d: (9*Cin, Cout) bf16; b: (1, Cout) f32."""
    N, H, W, Cin = x.shape
    Cout = w2d.shape[1]
    if fuse_pool:
        assert H % 2 == 0 and W % 2 == 0, "fused 2x2 pool needs even H, W"
    # Output-channel tiling: lane-dense blocks, bounded weight/output VMEM.
    tco = next((t for t in (256, 128) if Cout % t == 0), Cout)
    Ho, Wo = (H // 2, W // 2) if fuse_pool else (H, W)
    kern = functools.partial(_conv3x3_kernel, fuse_pool=fuse_pool)
    return pl.pallas_call(
        kern,
        out_shape=jax.ShapeDtypeStruct((N, Ho, Wo, Cout), jnp.float32),
        grid=(N, Cout // tco),
        in_specs=[
            pl.BlockSpec((1, H, W, Cin), lambda n, c: (n, 0, 0, 0)),
            pl.BlockSpec((9 * Cin, tco), lambda n, c: (0, c)),
            pl.BlockSpec((1, tco), lambda n, c: (0, c)),
        ],
        out_specs=pl.BlockSpec((1, Ho, Wo, tco), lambda n, c: (n, 0, 0, c)),
        compiler_params=pltpu.CompilerParams(
            dimension_semantics=("parallel", "parallel"),
            vmem_limit_bytes=_VMEM_LIMIT),
    )(x, w2d, b)


# --------------------------------------------------------------------------
# Tiled Linear (+ optional ReLU): grid over (Fout tiles, Fin tiles)
# --------------------------------------------------------------------------
def _linear_kernel(x_ref, w_ref, b_ref, o_ref, acc_ref, *, apply_relu):
    @pl.when(pl.program_id(1) == 0)
    def _init():
        acc_ref[...] = jnp.zeros_like(acc_ref)

    acc_ref[...] += jnp.dot(x_ref[...].astype(jnp.bfloat16), w_ref[...],
                            preferred_element_type=jnp.float32)

    @pl.when(pl.program_id(1) == pl.num_programs(1) - 1)
    def _fini():
        y = acc_ref[...] + b_ref[...]
        if apply_relu:
            y = jnp.maximum(y, 0.0)
        o_ref[...] = y.astype(o_ref.dtype)


def linear(x, w, b, apply_relu=False):
    """x: (N, Fin) f32; w: (Fin, Fout) bf16; b: (1, Fout) f32 -> (N, Fout) f32."""
    N, Fin = x.shape
    Fout = w.shape[1]
    tk = next((t for t in (512, 256, 128) if Fin % t == 0), Fin)
    tn = next((t for t in (512, 256, 128) if Fout % t == 0), Fout)
    return pl.pallas_call(
        functools.partial(_linear_kernel, apply_relu=apply_relu),
        out_shape=jax.ShapeDtypeStruct((N, Fout), jnp.float32),
        grid=(Fout // tn, Fin // tk),
        in_specs=[
            pl.BlockSpec((N, tk), lambda j, k: (0, k)),
            pl.BlockSpec((tk, tn), lambda j, k: (k, j)),
            pl.BlockSpec((1, tn), lambda j, k: (0, j)),
        ],
        out_specs=pl.BlockSpec((N, tn), lambda j, k: (0, j)),
        scratch_shapes=[pltpu.VMEM((N, tn), jnp.float32)],
        compiler_params=pltpu.CompilerParams(
            dimension_semantics=("parallel", "arbitrary"),
            vmem_limit_bytes=_VMEM_LIMIT),
    )(x, w, b)


# --------------------------------------------------------------------------
# Parameter init (deterministic, PyTorch-style uniform fan-in scaling).
# Weights are stored pre-reshaped / pre-permuted / pre-cast for the kernels.
# --------------------------------------------------------------------------
def init_vgg_params(key, chans, convs, in_chans, n_classes, hidden, spatial):
    params = {"extractor": [], "head": [], "n_classes": n_classes}

    prev = in_chans
    for chan, nconv in zip(chans, convs):
        group = []
        for _ in range(nconv):
            key, kw, kb = jax.random.split(key, 3)
            bound = 1.0 / float(prev * 9) ** 0.5
            w = jax.random.uniform(kw, (3, 3, prev, chan), jnp.float32,
                                   -bound, bound)
            b = jax.random.uniform(kb, (chan,), jnp.float32, -bound, bound)
            # Pre-reshape to (9*Cin, Cout) for the im2col matmul; cast to bf16.
            group.append((w.reshape(9 * prev, chan).astype(jnp.bfloat16),
                          b.reshape(1, chan)))
            prev = chan
        params["extractor"].append(group)

    fs = spatial // (2 ** len(chans))             # final spatial size
    flat = chans[-1] * fs * fs
    dims = [flat, hidden, hidden, n_classes]
    prev_pad = 0
    for li in range(3):
        fin, fout = dims[li], dims[li + 1]
        key, kw, kb = jax.random.split(key, 3)
        bound = 1.0 / float(fin) ** 0.5
        w = jax.random.uniform(kw, (fin, fout), jnp.float32, -bound, bound)
        b = jax.random.uniform(kb, (fout,), jnp.float32, -bound, bound)
        if li == 0:
            # Fold the NHWC->NCHW pre-flatten transpose into a one-time row
            # permutation of the first FC weight (rows were generated in
            # PyTorch NCHW-flatten order; reorder to NHWC-flatten order).
            w = (w.reshape(chans[-1], fs, fs, fout)
                   .transpose(1, 2, 0, 3).reshape(flat, fout))
        if prev_pad:                               # match previous layer's padded width
            w = jnp.pad(w, ((0, prev_pad), (0, 0)))
        pad = (-fout) % 128                        # lane-dense output stores
        if pad:
            w = jnp.pad(w, ((0, 0), (0, pad)))
            b = jnp.pad(b, ((0, pad),))
        prev_pad = pad
        params["head"].append((w.astype(jnp.bfloat16), b.reshape(1, -1)))
    return params


# --------------------------------------------------------------------------
# Forward pass (mirrors VGG.forward: extractor -> flatten -> head)
# --------------------------------------------------------------------------
def vgg_forward(params, x_nchw):
    # PyTorch-style NCHW input -> NHWC for the TPU kernels (one-time, tiny).
    x = jnp.transpose(x_nchw, (0, 2, 3, 1))
    for group in params["extractor"]:
        last = len(group) - 1
        for i, (w, b) in enumerate(group):
            # Conv2d(3x3,'same') + ReLU; the group's MaxPool2d(2) is fused
            # into the last conv's epilogue (ReLU and max-pool commute).
            x = conv3x3_relu(x, w, b, fuse_pool=(i == last))
    # Flatten directly in NHWC; NCHW flatten semantics are preserved because
    # the first FC weight's rows were permuted at init.
    x = x.reshape(x.shape[0], -1)
    (w1, b1), (w2, b2), (w3, b3) = params["head"]
    x = linear(x, w1, b1, apply_relu=True)      # LazyLinear + ReLU
    # TODO(synk): nn.Dropout(p=0.5) is identity at inference; training-mode
    # stochastic dropout (pltpu.prng_*) is not implemented.
    x = linear(x, w2, b2, apply_relu=True)      # Linear(hidden,hidden) + ReLU
    x = linear(x, w3, b3, apply_relu=False)     # Linear(hidden, n_classes)
    return x[:, :params["n_classes"]]           # drop lane padding


if __name__ == "__main__":
    key = jax.random.PRNGKey(0)
    key_x, key_p = jax.random.split(key)

    # Small shapes consistent with the module (hidden/n_classes shrunk for a
    # fast synthetic test).
    N, in_chans, S = 2, 3, 16
    chans, convs = (8, 16), (2, 2)
    n_classes, hidden = 10, 128

    params = init_vgg_params(key_p, chans, convs, in_chans, n_classes,
                             hidden, S)
    x = jax.random.normal(key_x, (N, in_chans, S, S), jnp.float32)  # NCHW

    out = vgg_forward(params, x)
    out = jax.block_until_ready(out)
    assert out.shape == (N, n_classes), out.shape
    assert bool(jnp.all(jnp.isfinite(out)))
    print("KERNEL_OK")
</pallas_src>

<mosaic_0001>
module attributes {stable_mosaic.version = 11 : i64} {
  func.func @_conv3x3_kernel(%arg0: i32, %arg1: i32, %arg2: memref<1x16x16x3xf32, #tpu.memory_space<vmem>>, %arg3: memref<27x8xbf16, #tpu.memory_space<vmem>>, %arg4: memref<1x8xf32, #tpu.memory_space<vmem>>, %arg5: memref<1x16x16x8xf32, #tpu.memory_space<vmem>>) attributes {dimension_semantics = [#tpu.dimension_semantics<parallel>, #tpu.dimension_semantics<parallel>], iteration_bounds = array<i64: 2, 1>, scalar_prefetch = 0 : i64, scratch_operands = 0 : i64, tpu.core_type = #tpu.core_type<tc>, window_params = [{transform_indices = @transform_0, window_bounds = array<i64: 1, 16, 16, 3>}, {transform_indices = @transform_1, window_bounds = array<i64: 27, 8>}, {transform_indices = @transform_2, window_bounds = array<i64: 1, 8>}, {transform_indices = @transform_3, window_bounds = array<i64: 1, 16, 16, 8>}]} {
    %c0 = arith.constant 0 : index
    %c0_0 = arith.constant 0 : index
    %c0_1 = arith.constant 0 : index
    %c0_2 = arith.constant 0 : index
    %0 = vector.load %arg2[%c0, %c0_0, %c0_1, %c0_2] : memref<1x16x16x3xf32, #tpu.memory_space<vmem>>, vector<1x16x16x3xf32>
    %1 = vector.shape_cast %0 : vector<1x16x16x3xf32> to vector<16x16x3xf32>
    %2 = arith.truncf %1 : vector<16x16x3xf32> to vector<16x16x3xbf16>
    %cst = arith.constant 0.000000e+00 : bf16
    %3 = vector.broadcast %cst : bf16 to vector<16x1x3xbf16>
    %4 = tpu.concatenate %3, %2, %3 in 1 : vector<16x1x3xbf16>, vector<16x16x3xbf16>, vector<16x1x3xbf16> -> vector<16x18x3xbf16>
    %cst_3 = arith.constant 0.000000e+00 : bf16
    %5 = vector.broadcast %cst_3 : bf16 to vector<1x18x3xbf16>
    %6 = tpu.concatenate %5, %4, %5 in 0 : vector<1x18x3xbf16>, vector<16x18x3xbf16>, vector<1x18x3xbf16> -> vector<18x18x3xbf16>
    %7 = vector.extract_strided_slice %6 {offsets = [0, 0, 0], sizes = [16, 16, 3], strides = [1, 1, 1]} : vector<18x18x3xbf16> to vector<16x16x3xbf16>
    %8 = vector.extract_strided_slice %6 {offsets = [0, 1, 0], sizes = [16, 16, 3], strides = [1, 1, 1]} : vector<18x18x3xbf16> to vector<16x16x3xbf16>
    %9 = vector.extract_strided_slice %6 {offsets = [0, 2, 0], sizes = [16, 16, 3], strides = [1, 1, 1]} : vector<18x18x3xbf16> to vector<16x16x3xbf16>
    %10 = vector.extract_strided_slice %6 {offsets = [1, 0, 0], sizes = [16, 16, 3], strides = [1, 1, 1]} : vector<18x18x3xbf16> to vector<16x16x3xbf16>
    %11 = vector.extract_strided_slice %6 {offsets = [1, 1, 0], sizes = [16, 16, 3], strides = [1, 1, 1]} : vector<18x18x3xbf16> to vector<16x16x3xbf16>
    %12 = vector.extract_strided_slice %6 {offsets = [1, 2, 0], sizes = [16, 16, 3], strides = [1, 1, 1]} : vector<18x18x3xbf16> to vector<16x16x3xbf16>
    %13 = vector.extract_strided_slice %6 {offsets = [2, 0, 0], sizes = [16, 16, 3], strides = [1, 1, 1]} : vector<18x18x3xbf16> to vector<16x16x3xbf16>
    %14 = vector.extract_strided_slice %6 {offsets = [2, 1, 0], sizes = [16, 16, 3], strides = [1, 1, 1]} : vector<18x18x3xbf16> to vector<16x16x3xbf16>
    %15 = vector.extract_strided_slice %6 {offsets = [2, 2, 0], sizes = [16, 16, 3], strides = [1, 1, 1]} : vector<18x18x3xbf16> to vector<16x16x3xbf16>
    %16 = tpu.concatenate %7, %8, %9, %10, %11, %12, %13, %14, %15 in 2 : vector<16x16x3xbf16>, vector<16x16x3xbf16>, vector<16x16x3xbf16>, vector<16x16x3xbf16>, vector<16x16x3xbf16>, vector<16x16x3xbf16>, vector<16x16x3xbf16>, vector<16x16x3xbf16>, vector<16x16x3xbf16> -> vector<16x16x27xbf16>
    %17 = vector.shape_cast %16 : vector<16x16x27xbf16> to vector<256x27xbf16>
    %c0_4 = arith.constant 0 : index
    %c0_5 = arith.constant 0 : index
    %18 = vector.load %arg3[%c0_4, %c0_5] : memref<27x8xbf16, #tpu.memory_space<vmem>>, vector<27x8xbf16>
    %cst_6 = arith.constant dense<0.000000e+00> : vector<256x8xf32>
    %19 = tpu.matmul %17, %18, %cst_6 {dimension_numbers = #tpu.dot_dimension_numbers<[1], [0], [0], [1], [0, 0, 1, 1], [], []>} : vector<256x27xbf16>, vector<27x8xbf16>, vector<256x8xf32> -> vector<256x8xf32>
    %c0_7 = arith.constant 0 : index
    %c0_8 = arith.constant 0 : index
    %20 = vector.load %arg4[%c0_7, %c0_8] : memref<1x8xf32, #tpu.memory_space<vmem>>, vector<1x8xf32>
    %21 = vector.broadcast %20 : vector<1x8xf32> to vector<256x8xf32>
    %22 = arith.addf %19, %21 : vector<256x8xf32>
    %cst_9 = arith.constant 0.000000e+00 : f32
    %23 = vector.broadcast %cst_9 : f32 to vector<256x8xf32>
    %24 = arith.maximumf %22, %23 : vector<256x8xf32>
    %25 = vector.shape_cast %24 : vector<256x8xf32> to vector<16x16x8xf32>
    %c0_10 = arith.constant 0 : index
    %c0_11 = arith.constant 0 : index
    %c0_12 = arith.constant 0 : index
    %c0_13 = arith.constant 0 : index
    %26 = vector.load %arg5[%c0_10, %c0_11, %c0_12, %c0_13] : memref<1x16x16x8xf32, #tpu.memory_space<vmem>>, vector<1x16x16x8xf32>
    %27 = vector.shape_cast %26 : vector<1x16x16x8xf32> to vector<16x16x8xf32>
    %28 = vector.shape_cast %25 : vector<16x16x8xf32> to vector<1x16x16x8xf32>
    tpu.vector_store %arg5[%c0_10, %c0_11, %c0_12, %c0_13], %28 {strides = array<i32>} : memref<1x16x16x8xf32, #tpu.memory_space<vmem>>, vector<1x16x16x8xf32>,
    return
  }
  func.func @transform_0(%arg0: i32, %arg1: i32) -> (i32, i32, i32, i32) {
    %c0_i32 = arith.constant 0 : i32
    %c0_i32_0 = arith.constant 0 : i32
    %c0_i32_1 = arith.constant 0 : i32
    %c0_i32_2 = arith.constant 0 : i32
    return %arg0, %c0_i32, %c0_i32_0, %c0_i32_1 : i32, i32, i32, i32
  }
  func.func @transform_1(%arg0: i32, %arg1: i32) -> (i32, i32) {
    %c0_i32 = arith.constant 0 : i32
    %c0_i32_0 = arith.constant 0 : i32
    return %c0_i32, %arg1 : i32, i32
  }
  func.func @transform_2(%arg0: i32, %arg1: i32) -> (i32, i32) {
    %c0_i32 = arith.constant 0 : i32
    %c0_i32_0 = arith.constant 0 : i32
    return %c0_i32, %arg1 : i32, i32
  }
  func.func @transform_3(%arg0: i32, %arg1: i32) -> (i32, i32, i32, i32) {
    %c0_i32 = arith.constant 0 : i32
    %c0_i32_0 = arith.constant 0 : i32
    %c0_i32_1 = arith.constant 0 : i32
    return %arg0, %c0_i32, %c0_i32_0, %arg1 : i32, i32, i32, i32
  }
}

</mosaic_0001>

<bundles_post_ra>
// kernel: tpu_custom_call.1
= control target key start
LH: loop header
LB: loop body
LE: loop exit
PB: predicated region body
PF: predicated region fallthrough
CT: control target
= control target key end

     0   :  { %s1830_s12 = smov 0   ;;  %s1832_s13 = smov 0   ;;  %s2746_s0 = inlined_call_operand.vmem [shape: f32[2,16,16,3], index: 0, kind: input, shape index: {}]   ;;  %s2747_s1 = inlined_call_operand.vmem [shape: bf16[27,8], index: 1, kind: input, shape index: {}]   ;;  %s2748_s2 = inlined_call_operand.vmem [shape: f32[1,8], index: 2, kind: input, shape index: {}]   ;;  %s2749_s3 = inlined_call_operand.vmem [shape: f32[2,16,16,8], index: 3, kind: output, shape index: {}]  }
   0x1   :  { %s1834_s14 = smov 0  }
   0x2 LB: > { %s25_s15 = sadd.s32 1, %s1794_s13  ;;  %p1654_p0 = scmp.ge.s32.totalorder %s1798_s14, 1  ;;  %s1798_s14 = sphi %s1834_s14, %s13_s14   ;;  %s1794_s13 = sphi %s1832_s13, %s2753_s13   ;;  %s1790_s12 = sphi %s1830_s12, %s2752_s12  }
   0x3   : > { %p27_p1 = scmp.ge.s32.totalorder %s25_s15, 2  ;;  %p168_p2 = scmp.lt.s32.totalorder %s1798_s14, 3 }
   0x5   : > { %s2755_s15 = smov (%p27_p1, %s25_s15), 0  ;;  %p169_p3 = pnand %p1654_p0, %p168_p2 }
   0x6   : > { %v1800_v0 = vmov (!%p169_p3), 0   ;;  %p202_p4 = scmp.lt.s32.totalorder (!%p169_p3), %s1790_s12, 1  ;;  %s1801_s16 = smov (!%p169_p3), 3   ;;  %vm415_vm0 = vcmask (!%p169_p3), 1040384   ;;  %vm416_vm1 = vsmask.f32 (!%p169_p3), 256 }
   0x7   : > { %172 = sbr.rel (%p169_p3) target bundleno = 615 (0x267), region = 32  ;;  %v1849_v1 = vrot.slane (!%p169_p3), %v1800_v0, 1  ;;  %s1802_s21 = smov (!%p169_p3), 6   ;;  %vm1876_vm2 = vmand (!%p169_p3), %vm415_vm0, %vm416_vm1  ;;  %vm702_vm3 = vcmask (!%p169_p3), 1046528   ;;  %vm450_vm4 = vsmask.f32 (!%p169_p3), 7424 }
   0x8   : > { %s1803_s22 = smov (!%p169_p3), 9   ;;  %s1804_s23 = smov (!%p169_p3), 12   ;;  %vm1310_vm5 = vcmask (!%p169_p3), 1044480   ;;  %vm1311_vm6 = vcmask (!%p169_p3), 1045504   ;;  %vm991_vm7 = vcmask (!%p169_p3), 23552   ;;  %vm1024_vm8 = vcmask (!%p169_p3), 48128  }
   0x9   : > { %639 = vrot.lane.b32.xlu0 (!%p169_p3), %v1849_v1, %s1801_s16  ;;  %s1805_s24 = smov (!%p169_p3), 15   ;;  %s1806_s25 = smov (!%p169_p3), 18   ;;  %vm1057_vm9 = vcmask (!%p169_p3), 72704   ;;  %vm1090_vm10 = vcmask (!%p169_p3), 97280   ;;  %vm1123_vm11 = vcmask (!%p169_p3), 121856   ;;  %vm1156_vm12 = vcmask (!%p169_p3), 146432  }
   0xa   : > { %s1807_s28 = smov (!%p169_p3), 21   ;;  %s1808_s4 = smov (!%p169_p3), 24   ;;  %vm1189_vm13 = vcmask (!%p169_p3), 171008   ;;  %vm1222_vm14 = vcmask (!%p169_p3), 195584   ;;  %vm1277_vm15 = vcmask (!%p169_p3), 220160   ;;  %vm1510_vm0 = vcmask (!%p169_p3), 64512  }
   0xd   : > { %750 = vrot.lane.b32.xlu0 (!%p169_p3), %v1849_v1, %s1802_s21 }
   0xe   : > { %s2757_s12 = smov (!%p202_p4, %s1790_s12), 1 }
   0xf   : > { %s1680_s17 = sshll.u32 %s2757_s12, 8 }
  0x10   : > { %s1861_s20 = scalar_lea.vmem %s2746_s0, %s1680_s17  ;;  %s2640_s9 = scalar_lea.vmem %s2749_s3, %s1680_s17 }
  0x11   : > { %v239_v2 = vld [vmem:[%s1861_s20 + $0x80] sm:$0xff]  ;;  %v240_v3 = vld [vmem:[%s1861_s20 + $0x88] sm:$0xff]  ;;  %v241_v7 = vld [vmem:[%s1861_s20 + $0x90] sm:$0xff] }
  0x12   : > { %v223_v4 = vld [vmem:[%s1861_s20] sm:$0xff]  ;;  %v263_v5 = vpack.c.bf16 %v240_v3, %v239_v2  ;;  %v224_v6 = vld [vmem:[%s1861_s20 + $0x8] sm:$0xff]  ;;  %v242_v8 = vld [vmem:[%s1861_s20 + $0x98] sm:$0xff] }
  0x13   : > { %v255_v9 = vpack.c.bf16 %v224_v6, %v223_v4  ;;  %v264_v10 = vpack.c.bf16 %v242_v8, %v241_v7  ;;  %v225_v11 = vld [vmem:[%s1861_s20 + $0x10] sm:$0xff]  ;;  %v226_v12 = vld [vmem:[%s1861_s20 + $0x18] sm:$0xff]  ;;  %v227_v7 = vld [vmem:[%s1861_s20 + $0x20] sm:$0xff] }
  0x14   : > { %v237_v13 = vld [vmem:[%s1861_s20 + $0x70] sm:$0xff]  ;;  %v328_v14 = vshrl.u32 %v263_v5, 16  ;;  %v331_v15 = vshll.u32 %v263_v5, 16  ;;  %v256_v16 = vpack.c.bf16 %v226_v12, %v225_v11  ;;  %v238_v17 = vld [vmem:[%s1861_s20 + $0x78] sm:$0xff]  ;;  %v228_v8 = vld [vmem:[%s1861_s20 + $0x28] sm:$0xff] }
  0x15   : > { %v272_v18 = vshrl.u32 %v255_v9, 16  ;;  %v275_v19 = vshll.u32 %v255_v9, 16  ;;  %v335_v20 = vshrl.u32 %v264_v10, 16  ;;  %v338_v21 = vshll.u32 %v264_v10, 16 }
  0x16   : > { %v330_v22 = vrot.slane %v328_v14, 7  ;;  %v279_v23 = vshrl.u32 %v256_v16, 16  ;;  %v282_v24 = vshll.u32 %v256_v16, 16  ;;  %v262_v25 = vpack.c.bf16 %v238_v17, %v237_v13 }
  0x17   : > { %v274_v27 = vrot.slane %v272_v18, 7  ;;  %v1880_v28 = vrot.slane %v335_v20, 7  ;;  %v257_v17 = vpack.c.bf16 %v228_v8, %v227_v7 }
  0x18   : > { %v333_v29 = vor.u32 %v331_v15, %v330_v22  ;;  %v281_v30 = vrot.slane %v279_v23, 7  ;;  %v321_v31 = vshrl.u32 %v262_v25, 16  ;;  %v324_v32 = vshll.u32 %v262_v25, 16 }
  0x19   : > { %v277_v33 = vor.u32 %v275_v19, %v274_v27  ;;  %v340_v34 = vor.u32 %v338_v21, %v1880_v28  ;;  %v434_v35 = vsel %vm1876_vm2, %v274_v27, 0  ;;  %v442_v41 = vsel %vm1876_vm2, %v330_v22, 0  ;;  %v243_v27 = vld [vmem:[%s1861_s20 + $0xa0] sm:$0xff] }
  0x1a   : > { %v1887_v36 = vsel %vm1876_vm2, 0, %v333_v29  ;;  %v284_v37 = vor.u32 %v282_v24, %v281_v30  ;;  %v323_v38 = vrot.slane %v321_v31, 7  ;;  %v706_v40 = vrot.slane %v434_v35, 1  ;;  %v244_v29 = vld [vmem:[%s1861_s20 + $0xa8] sm:$0xff] }
  0x1b   : > { %799 = vrot.lane.b32.xlu1 %v1887_v36, %s1803_s22  ;;  %v1893_v39 = vsel %vm1876_vm2, 0, %v277_v33  ;;  %v1901_v42 = vsel %vm1876_vm2, 0, %v340_v34  ;;  %v729_v50 = vrot.slane %v1887_v36, 1  ;;  %v730_v51 = vrot.slane %v442_v41, 1 }
  0x1c   : > { %783 = vrot.lane.b32.xlu0 %v1893_v39, %s1803_s22  ;;  %v326_v43 = vor.u32 %v324_v32, %v323_v38  ;;  %v441_v44 = vsel %vm1876_vm2, %v323_v38, 0  ;;  %v705_v45 = vrot.slane %v1893_v39, 1  ;;  %v1908_v46 = vsel %vm1876_vm2, 0, %v284_v37 }
  0x1d   : > { %v727_v47 = vrot.slane %v441_v44, 1  ;;  %v551_v48 = vshll.u32 %v441_v44, 16  ;;  %v462_v52 = vshll.u32 %v1893_v39, 16  ;;  %v467_v56 = vshll.u32 %v434_v35, 16 }
  0x1e   : > { %v1912_v49 = vsel %vm1876_vm2, 0, %v326_v43  ;;  %v707_v57 = vsel %vm702_vm3, %v705_v45, %v706_v40  ;;  %v460_v58 = vshrl.u32 %v1893_v39, 16  ;;  %v474_v63 = vshll.u32 %v1908_v46, 16 }
  0x1f   : > { %801 = vrot.lane.b32.xlu1 %v1901_v42, %s1803_s22  ;;  %v726_v53 = vrot.slane %v1912_v49, 1  ;;  %v544_v54 = vshrl.u32 %v1912_v49, 16  ;;  %v546_v55 = vshll.u32 %v1912_v49, 16  ;;  %v464_v59 = vrot.slane %v462_v52, 1 }
  0x20   : > { %785 = vrot.lane.b32.xlu0 %v1908_v46, %s1803_s22  ;;  %v553_v62 = vrot.slane %v551_v48, 1  ;;  %v435_v2 = vsel %vm1876_vm2, %v281_v30, 0  ;;  %v558_v3 = vshll.u32 %v1887_v36, 16  ;;  %v1935_v4 = vsel %vm702_vm3, %v729_v50, %v730_v51 }
  0x21   : > { %v1926_v60 = vsel %vm702_vm3, %v726_v53, %v727_v47  ;;  %v548_v61 = vrot.slane %v546_v55, 1  ;;  %v469_v6 = vrot.slane %v467_v56, 1  ;;  %v465_v9 = vor.u32 %v464_v59, %v460_v58 }
  0x22   : > { %v556_v10 = vshrl.u32 %v1887_v36, 16  ;;  %v560_v11 = vrot.slane %v558_v3, 1  ;;  %v563_v12 = vshll.u32 %v442_v41, 16  ;;  %v472_v14 = vshrl.u32 %v1908_v46, 16 }
  0x23   : > { %766 = vrot.lane.b32.xlu1 %v1926_v60, %s1802_s21  ;;  %v549_v5 = vor.u32 %v548_v61, %v544_v54  ;;  %v476_v15 = vrot.slane %v474_v63, 1  ;;  %v479_v16 = vshll.u32 %v435_v2, 16  ;;  %v470_v18 = vsel %vm450_vm4, %v465_v9, %v469_v6 }
  0x24   : > { %752 = vrot.lane.b32.xlu0 %v707_v57, %s1802_s21  ;;  %v561_v19 = vor.u32 %v560_v11, %v556_v10  ;;  %v565_v20 = vrot.slane %v563_v12, 1  ;;  %v570_v21 = vshll.u32 %v1901_v42, 16  ;;  %v443_v24 = vsel %vm1876_vm2, %v1880_v28, 0 }
  0x25   : > { %v1942_v13 = vsel %vm450_vm4, %v549_v5, %v553_v62  ;;  %v477_v22 = vor.u32 %v476_v15, %v472_v14  ;;  %v481_v23 = vrot.slane %v479_v16, 1  ;;  %v286_v25 = vshrl.u32 %v257_v17, 16  ;;  %v1775_v15 = vld [vmem:[%s2747_s1 + $0x8] sm:$0x3f]   ;;  %v229_v16 = vld [vmem:[%s1861_s20 + $0x30] sm:$0xff] }
  0x26   : > { %v1959_v30 = vsel %vm450_vm4, %v561_v19, %v565_v20  ;;  %v568_v31 = vshrl.u32 %v1901_v42, 16  ;;  %v572_v32 = vrot.slane %v570_v21, 1  ;;  %v575_v33 = vshll.u32 %v443_v24, 16 }
  0x27   : > { %768 = vrot.lane.b32.xlu1 %v1935_v4, %s1802_s21  ;;  %v1963_v34 = vsel %vm450_vm4, %v477_v22, %v481_v23  ;;  %v265_v35 = vpack.c.bf16 %v244_v29, %v243_v27  ;;  %v288_v28 = vrot.slane %v286_v25, 7  ;;  %v289_v37 = vshll.u32 %v257_v17, 16  ;;  %v230_v17 = vld [vmem:[%s1861_s20 + $0x38] sm:$0xff] }
  0x28   : > { %655 = vrot.lane.b32.xlu0 %v1942_v13, %s1801_s16  ;;  %v573_v38 = vor.u32 %v572_v32, %v568_v31  ;;  %v577_v40 = vrot.slane %v575_v33, 1  ;;  %v708_v41 = vrot.slane %v1908_v46, 1  ;;  %v709_v43 = vrot.slane %v435_v2, 1  ;;  %v1774_v2 = vld [vmem:[%s2747_s1] sm:$0xff]   ;;  %v245_v31 = vld [vmem:[%s1861_s20 + $0xb0] sm:$0xff]  ;;  %v246_v32 = vld [vmem:[%s1861_s20 + $0xb8] sm:$0xff] }
  0x29   : > { %v342_v44 = vshrl.u32 %v265_v35, 16  ;;  %v291_v45 = vor.u32 %v289_v37, %v288_v28  ;;  %v345_v51 = vshll.u32 %v265_v35, 16  ;;  %v732_v53 = vrot.slane %v1901_v42, 1  ;;  %1700 = vmatprep.subr.bf16.mxu0 %v1774_v2  ;;  %1736 = vmatprep.subr.bf16.mxu1 %v1774_v2 }
  0x2a   : > { %v1974_v47 = vsel %vm450_vm4, %v573_v38, %v577_v40  ;;  %v1977_v48 = vsel %vm702_vm3, %v708_v41, %v709_v43  ;;  %v733_v54 = vrot.slane %v443_v24, 1  ;;  %1701 = vmatpush3.bf16.msra.mxu0 %v1774_v2  ;;  %1738 = vmatpush3.bf16.msra.mxu1 %v1774_v2  ;;  %v1809_v19 = vmov 65535  }
  0x2b   : > { %641 = vrot.lane.b32.xlu1 %v470_v18, %s1801_s16  ;;  %v344_v50 = vrot.slane %v342_v44, 7  ;;  %v1981_v52 = vsel %vm1876_vm2, 0, %v291_v45  ;;  %v1312_v20 = vsel %vm1310_vm5, 4294967295, %v1809_v19  ;;  %v258_v24 = vpack.c.bf16 %v230_v17, %v229_v16 }
  0x2c   : > { %827 = vrot.lane.b32.xlu0 %v470_v18, %s1804_s23  ;;  %v486_v55 = vshll.u32 %v1981_v52, 16  ;;  %v1996_v58 = vsel %vm702_vm3, %v732_v53, %v733_v54  ;;  %v484_v59 = vshrl.u32 %v1981_v52, 16  ;;  %v711_v21 = vrot.slane %v1981_v52, 1  ;;  %v232_v53 = vld [vmem:[%s1861_s20 + $0x48] sm:$0xff] }
  0x2d   : > { %v347_v56 = vor.u32 %v345_v51, %v344_v50  ;;  %v444_v7 = vsel %vm1876_vm2, %v344_v50, 0  ;;  %v1313_v23 = vsel %vm1311_vm6, %v1312_v20, 0  ;;  %v293_v29 = vshrl.u32 %v258_v24, 16 }
  0x2e   : > { %v488_v61 = vrot.slane %v486_v55, 1  ;;  %v587_v10 = vshll.u32 %v444_v7, 16  ;;  %v1315_v25 = vand.u32 %v1775_v15, %v1313_v23  ;;  %v736_v35 = vrot.slane %v444_v7, 1 }
  0x2f   : > { %657 = vrot.lane.b32.xlu1 %v1959_v30, %s1801_s16  ;;  %v2001_v63 = vsel %vm1876_vm2, 0, %v347_v56  ;;  %v296_v37 = vshll.u32 %v258_v24, 16 }
  0x30   : > { %829 = vrot.lane.b32.xlu0 %v1963_v34, %s1804_s23  ;;  %v582_v3 = vshll.u32 %v2001_v63, 16  ;;  %v489_v5 = vor.u32 %v488_v61, %v484_v59  ;;  %v580_v8 = vshrl.u32 %v2001_v63, 16  ;;  %v589_v14 = vrot.slane %v587_v10, 1  ;;  %1702 = vmatprep.subr.bf16.mxu0 %v1315_v25 }
  0x31   : > { %1703 = vmatpush3.bf16.msra.mxu0 %v1315_v25  ;;  %1737 = vmatprep.subr.bf16.mxu1 %v1315_v25  ;;  %v735_v33 = vrot.slane %v2001_v63, 1 }
  0x32   : > { %v584_v9 = vrot.slane %v582_v3, 1  ;;  %1739 = vmatpush3.bf16.msra.mxu1 %v1315_v25 }
  0x33   : > { %843 = vrot.lane.b32.xlu1 %v1959_v30, %s1804_s23  ;;  %v737_v38 = vsel %vm702_vm3, %v735_v33, %v736_v35 }
  0x34   : > { %863 = vrot.lane.b32.xlu0 %v707_v57, %s1805_s24  ;;  %v436_v57 = vsel %vm1876_vm2, %v288_v28, 0  ;;  %v585_v12 = vor.u32 %v584_v9, %v580_v8  ;;  %v295_v28 = vrot.slane %v293_v29, 7 }
  0x35   : > { %v491_v62 = vshll.u32 %v436_v57, 16  ;;  %v712_v22 = vrot.slane %v436_v57, 1 }
  0x36   : > { %v2035_v18 = vsel %vm450_vm4, %v585_v12, %v589_v14  ;;  %v298_v41 = vor.u32 %v296_v37, %v295_v28  ;;  %v437_v51 = vsel %vm1876_vm2, %v295_v28, 0 }
  0x37   : > { %845 = vrot.lane.b32.xlu1 %v1974_v47, %s1804_s23  ;;  %v493_v6 = vrot.slane %v491_v62, 1  ;;  %v2043_v27 = vsel %vm702_vm3, %v711_v21, %v712_v22  ;;  %v503_v56 = vshll.u32 %v437_v51, 16  ;;  %v715_v20 = vrot.slane %v437_v51, 1 }
  0x38   : > { %865 = vrot.lane.b32.xlu0 %v1977_v48, %s1805_s24  ;;  %v2062_v45 = vsel %vm1876_vm2, 0, %v298_v41 }
  0x39   : > { %v2019_v11 = vsel %vm450_vm4, %v489_v5, %v493_v6  ;;  %v496_v54 = vshrl.u32 %v2062_v45, 16  ;;  %v505_v62 = vrot.slane %v503_v56, 1  ;;  %v247_v5 = vld [vmem:[%s1861_s20 + $0xc0] sm:$0xff]  ;;  %v248_v6 = vld [vmem:[%s1861_s20 + $0xc8] sm:$0xff]  ;;  %v714_v19 = vrot.slane %v2062_v45, 1 }
  0x3a   : > { %v267_v12 = vpack.c.bf16 %v248_v6, %v247_v5 }
  0x3b   : > { %879 = vrot.lane.b32.xlu1 %v1935_v4, %s1805_s24  ;;  %v2108_v23 = vsel %vm702_vm3, %v714_v19, %v715_v20 }
  0x3c   : > { %895 = vrot.lane.b32.xlu0 %v1908_v46, %s1806_s25  ;;  %v359_v25 = vshll.u32 %v267_v12, 16 }
  0x3f   : > { %881 = vrot.lane.b32.xlu1 %v1996_v58, %s1805_s24 }
  0x40   : > { %897 = vrot.lane.b32.xlu0 %v1981_v52, %s1806_s25 }
  0x43   : > { %911 = vrot.lane.b32.xlu1 %v1901_v42, %s1806_s25 }
  0x44   : > { %927 = vrot.lane.b32.xlu0 %v1963_v34, %s1807_s28 }
  0x47   : > { %913 = vrot.lane.b32.xlu1 %v2001_v63, %s1806_s25 }
  0x48   : > { %929 = vrot.lane.b32.xlu0 %v2019_v11, %s1807_s28 }
  0x4b   : > { %943 = vrot.lane.b32.xlu1 %v1974_v47, %s1807_s28 }
  0x4c   : > { %959 = vrot.lane.b32.xlu0 %v1977_v48, %s1808_s4 }
  0x4f   : > { %945 = vrot.lane.b32.xlu1 %v2035_v18, %s1807_s28 }
  0x50   : > { %643 = vrot.lane.b32.xlu0 %v1963_v34, %s1801_s16  ;;  %v266_v34 = vpack.c.bf16 %v246_v32, %v245_v31 }
  0x52   : > { %v349_v40 = vshrl.u32 %v266_v34, 16  ;;  %v352_v44 = vshll.u32 %v266_v34, 16 }
  0x53   : > { %975 = vrot.lane.b32.xlu1 %v1996_v58, %s1808_s4 }
  0x54   : > { %961 = vrot.lane.b32.xlu0 %v2043_v27, %s1808_s4  ;;  %v351_v43 = vrot.slane %v349_v40, 7 }
  0x56   : > { %v354_v50 = vor.u32 %v352_v44, %v351_v43  ;;  %v445_v2 = vsel %vm1876_vm2, %v351_v43, 0 }
  0x57   : > { %659 = vrot.lane.b32.xlu1 %v1974_v47, %s1801_s16  ;;  %v498_v47 = vshll.u32 %v2062_v45, 16  ;;  %v599_v9 = vshll.u32 %v445_v2, 16 }
  0x58   : > { %645 = vrot.lane.b32.xlu0 %v2019_v11, %s1801_s16  ;;  %v2080_v57 = vsel %vm1876_vm2, 0, %v354_v50 }
  0x59   : > { %v500_v55 = vrot.slane %v498_v47, 1  ;;  %v592_v7 = vshrl.u32 %v2080_v57, 16  ;;  %v601_v17 = vrot.slane %v599_v9, 1 }
  0x5b   : > { %977 = vrot.lane.b32.xlu1 %v737_v38, %s1808_s4  ;;  %v501_v61 = vor.u32 %v500_v55, %v496_v54 }
  0x5c   : > { %754 = vrot.lane.b32.xlu0 %v1977_v48, %s1802_s21  ;;  %v231_v48 = vld [vmem:[%s1861_s20 + $0x40] sm:$0xff] }
  0x5d   : > { %v259_v59 = vpack.c.bf16 %v232_v53, %v231_v48  ;;  %v506_v10 = vsel %vm450_vm4, %v501_v61, %v505_v62 }
  0x5f   : > { %661 = vrot.lane.b32.xlu1 %v2035_v18, %s1801_s16  ;;  %v300_v3 = vshrl.u32 %v259_v59, 16  ;;  %v303_v15 = vshll.u32 %v259_v59, 16  ;;  %v233_v59 = vld [vmem:[%s1861_s20 + $0x50] sm:$0xff] }
  0x60   : > { %756 = vrot.lane.b32.xlu0 %v2043_v27, %s1802_s21 }
  0x61   : > { %v302_v14 = vrot.slane %v300_v3, 7 }
  0x63   : > { %770 = vrot.lane.b32.xlu1 %v1996_v58, %s1802_s21  ;;  %v594_v58 = vshll.u32 %v2080_v57, 16  ;;  %v305_v21 = vor.u32 %v303_v15, %v302_v14  ;;  %v438_v33 = vsel %vm1876_vm2, %v302_v14, 0  ;;  %v249_v14 = vld [vmem:[%s1861_s20 + $0xd0] sm:$0xff]  ;;  %v250_v15 = vld [vmem:[%s1861_s20 + $0xd8] sm:$0xff] }
  0x64   : > { %787 = vrot.lane.b32.xlu0 %v1981_v52, %s1803_s22  ;;  %v515_v37 = vshll.u32 %v438_v33, 16  ;;  %v718_v3 = vrot.slane %v438_v33, 1  ;;  %v268_v19 = vpack.c.bf16 %v250_v15, %v249_v14 }
  0x65   : > { %v596_v8 = vrot.slane %v594_v58, 1  ;;  %v2112_v29 = vsel %vm1876_vm2, 0, %v305_v21  ;;  %v234_v58 = vld [vmem:[%s1861_s20 + $0x58] sm:$0xff] }
  0x66   : > { %v510_v31 = vshll.u32 %v2112_v29, 16  ;;  %v508_v34 = vshrl.u32 %v2112_v29, 16  ;;  %v517_v43 = vrot.slane %v515_v37, 1  ;;  %v260_v6 = vpack.c.bf16 %v234_v58, %v233_v59 }
  0x67   : > { %772 = vrot.lane.b32.xlu1 %v737_v38, %s1802_s21  ;;  %v597_v16 = vor.u32 %v596_v8, %v592_v7  ;;  %v366_v33 = vshll.u32 %v268_v19, 16 }
  0x68   : > { %789 = vrot.lane.b32.xlu0 %v2062_v45, %s1803_s22  ;;  %v512_v28 = vrot.slane %v510_v31, 1  ;;  %v310_v21 = vshll.u32 %v260_v6, 16 }
  0x69   : > { %v2105_v22 = vsel %vm450_vm4, %v597_v16, %v601_v17 }
  0x6a   : > { %v513_v41 = vor.u32 %v512_v28, %v508_v34 }
  0x6b   : > { %803 = vrot.lane.b32.xlu1 %v2001_v63, %s1803_s22 }
  0x6c   : > { %831 = vrot.lane.b32.xlu0 %v2019_v11, %s1804_s23  ;;  %v356_v11 = vshrl.u32 %v267_v12, 16  ;;  %v2147_v53 = vsel %vm450_vm4, %v513_v41, %v517_v43  ;;  %v307_v12 = vshrl.u32 %v260_v6, 16 }
  0x6e   : > { %v358_v24 = vrot.slane %v356_v11, 7  ;;  %v309_v11 = vrot.slane %v307_v12, 7 }
  0x6f   : > { %805 = vrot.lane.b32.xlu1 %v2080_v57, %s1803_s22 }
  0x70   : > { %833 = vrot.lane.b32.xlu0 %v506_v10, %s1804_s23  ;;  %v361_v32 = vor.u32 %v359_v25, %v358_v24  ;;  %v446_v44 = vsel %vm1876_vm2, %v358_v24, 0  ;;  %v312_v31 = vor.u32 %v310_v21, %v309_v11  ;;  %v439_v43 = vsel %vm1876_vm2, %v309_v11, 0 }
  0x71   : > { %v611_v48 = vshll.u32 %v446_v44, 16  ;;  %v742_v17 = vrot.slane %v446_v44, 1  ;;  %v235_v44 = vld [vmem:[%s1861_s20 + $0x60] sm:$0xff] }
  0x72   : > { %v2131_v40 = vsel %vm1876_vm2, 0, %v361_v32  ;;  %v2211_v28 = vsel %vm1876_vm2, 0, %v312_v31 }
  0x73   : > { %847 = vrot.lane.b32.xlu1 %v2035_v18, %s1804_s23  ;;  %v738_v18 = vrot.slane %v2080_v57, 1  ;;  %v604_v50 = vshrl.u32 %v2131_v40, 16  ;;  %v613_v56 = vrot.slane %v611_v48, 1  ;;  %v741_v16 = vrot.slane %v2131_v40, 1 }
  0x74   : > { %867 = vrot.lane.b32.xlu0 %v2043_v27, %s1805_s24  ;;  %v739_v27 = vrot.slane %v445_v2, 1  ;;  %v717_v2 = vrot.slane %v2112_v29, 1  ;;  %v520_v48 = vshrl.u32 %v2211_v28, 16 }
  0x75   : > { %v2195_v24 = vsel %vm702_vm3, %v741_v16, %v742_v17  ;;  %v251_v17 = vld [vmem:[%s1861_s20 + $0xe0] sm:$0xff] }
  0x76   : > { %v2126_v35 = vsel %vm702_vm3, %v738_v18, %v739_v27  ;;  %v2175_v8 = vsel %vm702_vm3, %v717_v2, %v718_v3  ;;  %v363_v18 = vshrl.u32 %v268_v19, 16  ;;  %v252_v19 = vld [vmem:[%s1861_s20 + $0xe8] sm:$0xff] }
  0x77   : > { %849 = vrot.lane.b32.xlu1 %v2105_v22, %s1804_s23 }
  0x78   : > { %869 = vrot.lane.b32.xlu0 %v2108_v23, %s1805_s24  ;;  %v365_v32 = vrot.slane %v363_v18, 7 }
  0x7a   : > { %v2248_v14 = vsel %vm1876_vm2, %v365_v32, 0 }
  0x7b   : > { %883 = vrot.lane.b32.xlu1 %v737_v38, %s1805_s24  ;;  %v606_v38 = vshll.u32 %v2131_v40, 16  ;;  %v2140_v47 = vpop.permute.xlu0 %639  ;;  %v623_v18 = vshll.u32 %v2248_v14, 16 }
  0x7c   : > { %899 = vrot.lane.b32.xlu0 %v2062_v45, %s1806_s25 }
  0x7d   : > { %v608_v51 = vrot.slane %v606_v38, 1  ;;  %v368_v38 = vor.u32 %v366_v33, %v365_v32  ;;  %v269_v33 = vpack.c.bf16 %v252_v19, %v251_v17 }
  0x7f   : > { %885 = vrot.lane.b32.xlu1 %v2126_v35, %s1805_s24  ;;  %v2153_v54 = vpop.permute.xlu0 %750  ;;  %v609_v55 = vor.u32 %v608_v51, %v604_v50  ;;  %v236_v50 = vld [vmem:[%s1861_s20 + $0x68] sm:$0xff]  ;;  %v2235_v59 = vsel %vm1876_vm2, 0, %v368_v38 }
  0x80   : > { %901 = vrot.lane.b32.xlu0 %v2112_v29, %s1806_s25  ;;  %v618_v2 = vshll.u32 %v2235_v59, 16  ;;  %v616_v11 = vshrl.u32 %v2235_v59, 16 }
  0x81   : > { %v2162_v61 = vsel %vm450_vm4, %v609_v55, %v613_v56  ;;  %v527_v56 = vshll.u32 %v439_v43, 16 }
  0x82   : > { %v620_v21 = vrot.slane %v618_v2, 1  ;;  %v370_v2 = vshrl.u32 %v269_v33, 16 }
  0x83   : > { %915 = vrot.lane.b32.xlu1 %v2080_v57, %s1806_s25  ;;  %v529_v12 = vrot.slane %v527_v56, 1  ;;  %v721_v56 = vrot.slane %v439_v43, 1 }
  0x84   : > { %931 = vrot.lane.b32.xlu0 %v506_v10, %s1807_s28  ;;  %v372_v19 = vrot.slane %v370_v2, 7 }
  0x87   : > { %917 = vrot.lane.b32.xlu1 %v2131_v40, %s1806_s25 }
  0x88   : > { %933 = vrot.lane.b32.xlu0 %v2147_v53, %s1807_s28 }
  0x8b   : > { %947 = vrot.lane.b32.xlu1 %v2105_v22, %s1807_s28 }
  0x8c   : > { %963 = vrot.lane.b32.xlu0 %v2108_v23, %s1808_s4 }
  0x8d   : > { %v2164_v62 = vpop.permute.xlu1 %799 }
  0x8e   : > { %v2167_v5 = vpop.permute.xlu0 %783 }
  0x8f   : > { %949 = vrot.lane.b32.xlu1 %v2162_v61, %s1807_s28 }
  0x90   : > { %647 = vrot.lane.b32.xlu0 %v506_v10, %s1801_s16 }
  0x91   : > { %v2172_v7 = vpop.permute.xlu1 %801 }
  0x92   : > { %v2177_v9 = vpop.permute.xlu0 %785 }
  0x93   : > { %979 = vrot.lane.b32.xlu1 %v2126_v35, %s1808_s4 }
  0x94   : > { %965 = vrot.lane.b32.xlu0 %v2175_v8, %s1808_s4 }
  0x95   : > { %v2186_v10 = vpop.permute.xlu1 %766 }
  0x96   : > { %v2188_v20 = vpop.permute.xlu0 %752 }
  0x97   : > { %663 = vrot.lane.b32.xlu1 %v2105_v22, %s1801_s16 }
  0x98   : > { %649 = vrot.lane.b32.xlu0 %v2147_v53, %s1801_s16 }
  0x99   : > { %v2197_v25 = vpop.permute.xlu1 %768 }
  0x9a   : > { %v2199_v27 = vpop.permute.xlu0 %655 }
  0x9b   : > { %981 = vrot.lane.b32.xlu1 %v2195_v24, %s1808_s4 }
  0x9c   : > { %758 = vrot.lane.b32.xlu0 %v2108_v23, %s1802_s21  ;;  %v522_v23 = vshll.u32 %v2211_v28, 16 }
  0x9d   : > { %v2205_v22 = vpop.permute.xlu1 %641 }
  0x9e   : > { %v2207_v34 = vpop.permute.xlu0 %827  ;;  %v524_v55 = vrot.slane %v522_v23, 1 }
  0x9f   : > { %665 = vrot.lane.b32.xlu1 %v2162_v61, %s1801_s16 }
  0xa0   : > { %760 = vrot.lane.b32.xlu0 %v2175_v8, %s1802_s21  ;;  %v525_v6 = vor.u32 %v524_v55, %v520_v48  ;;  %v720_v55 = vrot.slane %v2211_v28, 1 }
  0xa1   : > { %v2217_v37 = vpop.permute.xlu1 %657 }
  0xa2   : > { %v2220_v41 = vpop.permute.xlu0 %829  ;;  %v2263_v32 = vsel %vm450_vm4, %v525_v6, %v529_v12  ;;  %v2284_v43 = vsel %vm702_vm3, %v720_v55, %v721_v56  ;;  %v995_v55 = vsel %vm991_vm7, %v1893_v39, %v2205_v22  ;;  %v1009_v56 = vsel %vm991_vm7, %v1912_v49, %v2199_v27 }
  0xa3   : > { %774 = vrot.lane.b32.xlu1 %v2126_v35, %s1802_s21  ;;  %v261_v35 = vpack.c.bf16 %v236_v50, %v235_v44  ;;  %v625_v50 = vrot.slane %v623_v18, 1  ;;  %v745_v18 = vrot.slane %v2248_v14, 1 }
  0xa4   : > { %791 = vrot.lane.b32.xlu0 %v2112_v29, %s1803_s22 }
  0xa5   : > { %v2230_v51 = vpop.permute.xlu1 %843  ;;  %v314_v16 = vshrl.u32 %v261_v35, 16  ;;  %v317_v44 = vshll.u32 %v261_v35, 16  ;;  %v993_v35 = vsel %vm991_vm7, 0, %v2140_v47 }
  0xa6   : > { %v2237_v58 = vpop.permute.xlu0 %863  ;;  %v1026_v47 = vsel %vm1024_vm8, %v993_v35, %v2153_v54  ;;  %v1042_v35 = vsel %vm1024_vm8, %v1009_v56, %v2186_v10 }
  0xa7   : > { %776 = vrot.lane.b32.xlu1 %v2195_v24, %s1802_s21  ;;  %v316_v38 = vrot.slane %v314_v16, 7 }
  0xa8   : > { %793 = vrot.lane.b32.xlu0 %v2211_v28, %s1803_s22 }
  0xa9   : > { %v2244_v3 = vpop.permute.xlu1 %845  ;;  %v319_v12 = vor.u32 %v317_v44, %v316_v38  ;;  %v2302_v44 = vsel %vm1876_vm2, %v316_v38, 0 }
  0xaa   : > { %v2250_v15 = vpop.permute.xlu0 %865  ;;  %v539_v27 = vshll.u32 %v2302_v44, 16 }
  0xab   : > { %807 = vrot.lane.b32.xlu1 %v2131_v40, %s1803_s22 }
  0xac   : > { %835 = vrot.lane.b32.xlu0 %v2147_v53, %s1804_s23  ;;  %v621_v53 = vor.u32 %v620_v21, %v616_v11  ;;  %v373_v11 = vshll.u32 %v269_v33, 16 }
  0xad   : > { %v2260_v31 = vpop.permute.xlu1 %879 }
  0xae   : > { %v896_v23 = vpop.permute.xlu0 %895  ;;  %v2281_v16 = vsel %vm450_vm4, %v621_v53, %v625_v50  ;;  %v375_v53 = vor.u32 %v373_v11, %v372_v19  ;;  %v1059_v50 = vsel %vm1057_vm9, %v1026_v47, %v2167_v5 }
  0xaf   : > { %809 = vrot.lane.b32.xlu1 %v2235_v59, %s1803_s22  ;;  %v1092_v38 = vsel %vm1090_vm10, %v1059_v50, %v2207_v34  ;;  %v1028_v34 = vsel %vm1024_vm8, %v995_v55, %v2188_v20 }
  0xb0   : > { %837 = vrot.lane.b32.xlu0 %v2263_v32, %s1804_s23  ;;  %v1125_v5 = vsel %vm1123_vm11, %v1092_v38, %v2237_v58  ;;  %v2331_v58 = vsel %vm1876_vm2, 0, %v375_v53  ;;  %v1061_v20 = vsel %vm1057_vm9, %v1028_v34, %v2177_v9  ;;  %v541_v53 = vrot.slane %v539_v27, 1 }
  0xb1   : > { %v2269_v48 = vpop.permute.xlu1 %881  ;;  %v630_v10 = vshll.u32 %v2331_v58, 16  ;;  %v1094_v55 = vsel %vm1090_vm10, %v1061_v20, %v2220_v41  ;;  %v628_v41 = vshrl.u32 %v2331_v58, 16 }
  0xb2   : > { %v2272_v6 = vpop.permute.xlu0 %897 }
  0xb3   : > { %851 = vrot.lane.b32.xlu1 %v2162_v61, %s1804_s23  ;;  %v2288_v61 = vsel %vm1876_vm2, 0, %v319_v12 }
  0xb4   : > { %871 = vrot.lane.b32.xlu0 %v2175_v8, %s1805_s24  ;;  %v744_v8 = vrot.slane %v2235_v59, 1  ;;  %v534_v54 = vshll.u32 %v2288_v61, 16  ;;  %v532_v22 = vshrl.u32 %v2288_v61, 16 }
  0xb5   : > { %v912_v17 = vpop.permute.xlu1 %911 }
  0xb6   : > { %v928_v21 = vpop.permute.xlu0 %927  ;;  %v2322_v39 = vsel %vm702_vm3, %v744_v8, %v745_v18  ;;  %v536_v12 = vrot.slane %v534_v54, 1 }
  0xb7   : > { %853 = vrot.lane.b32.xlu1 %v2281_v16, %s1804_s23 }
  0xb8   : > { %873 = vrot.lane.b32.xlu0 %v2284_v43, %s1805_s24  ;;  %v537_v54 = vor.u32 %v536_v12, %v532_v22 }
  0xb9   : > { %v2298_v33 = vpop.permute.xlu1 %913 }
  0xba   : > { %v930_v14 = vpop.permute.xlu0 %929  ;;  %v2375_v27 = vsel %vm450_vm4, %v537_v54, %v541_v53 }
  0xbb   : > { %887 = vrot.lane.b32.xlu1 %v2195_v24, %s1805_s24  ;;  %v1158_v24 = vsel %vm1156_vm12, %v1125_v5, %v896_v23  ;;  %v2346_v23 = vsel %vm1876_vm2, %v372_v19, 0  ;;  %v1011_v19 = vsel %vm991_vm7, %v1887_v36, %v2217_v37  ;;  %v632_v5 = vrot.slane %v630_v10, 1 }
  0xbc   : > { %903 = vrot.lane.b32.xlu0 %v2211_v28, %s1806_s25  ;;  %v1191_v11 = vsel %vm1189_vm13, %v1158_v24, %v928_v21  ;;  %v1075_v21 = vsel %vm1057_vm9, %v1042_v35, %v2164_v62  ;;  %v635_v62 = vshll.u32 %v2346_v23, 16  ;;  %v723_v10 = vrot.slane %v2288_v61, 1 }
  0xbd   : > { %v944_v2 = vpop.permute.xlu1 %943  ;;  %v1108_v9 = vsel %vm1090_vm10, %v1075_v21, %v2230_v51  ;;  %v1127_v51 = vsel %vm1123_vm11, %v1094_v55, %v2250_v15  ;;  %v1044_v15 = vsel %vm1024_vm8, %v1011_v19, %v2197_v25  ;;  %v254_v55 = vld [vmem:[%s1861_s20 + $0xf8] sm:$0xff]  ;;  %v748_v19 = vrot.slane %v2346_v23, 1 }
  0xbe   : > { %v960_v47 = vpop.permute.xlu0 %959  ;;  %v1141_v56 = vsel %vm1123_vm11, %v1108_v9, %v2260_v31  ;;  %v1160_v37 = vsel %vm1156_vm12, %v1127_v51, %v2272_v6  ;;  %v633_v6 = vor.u32 %v632_v5, %v628_v41  ;;  %v1077_v25 = vsel %vm1057_vm9, %v1044_v15, %v2172_v7  ;;  %v253_v9 = vld [vmem:[%s1861_s20 + $0xf0] sm:$0xff] }
  0xbf   : > { %v1224_v8 = vsel %vm1222_vm14, %v1191_v11, %v960_v47  ;;  %889 = vrot.lane.b32.xlu1 %v2322_v39, %s1805_s24  ;;  %v1174_v38 = vsel %vm1156_vm12, %v1141_v56, %v912_v17  ;;  %v1193_v17 = vsel %vm1189_vm13, %v1160_v37, %v930_v14  ;;  %v1110_v35 = vsel %vm1090_vm10, %v1077_v25, %v2244_v3 }
  0xc0   : > { %905 = vrot.lane.b32.xlu0 %v2288_v61, %s1806_s25  ;;  %1704 = vmatprep.mubr.msk.bf16.mxu0 %vm1277_vm15, %v1224_v8  ;;  %v1207_v31 = vsel %vm1189_vm13, %v1174_v38, %v944_v2  ;;  %v637_v2 = vrot.slane %v635_v62, 1  ;;  %v1143_v47 = vsel %vm1123_vm11, %v1110_v35, %v2269_v48  ;;  %v724_v48 = vrot.slane %v2302_v44, 1 }
  0xc1   : > { %v946_v18 = vpop.permute.xlu1 %945  ;;  %v1176_v8 = vsel %vm1156_vm12, %v1143_v47, %v2298_v33  ;;  %v747_v44 = vrot.slane %v2331_v58, 1 }
  0xc2   : > { %v2353_v50 = vpop.permute.xlu0 %643  ;;  %v638_v7 = vsel %vm450_vm4, %v633_v6, %v637_v2  ;;  %v1209_v3 = vsel %vm1189_vm13, %v1176_v8, %v946_v18  ;;  %v725_v18 = vsel %vm702_vm3, %v723_v10, %v724_v48 }
  0xc3   : > { %919 = vrot.lane.b32.xlu1 %v2235_v59, %s1806_s25  ;;  %v749_v51 = vsel %vm702_vm3, %v747_v44, %v748_v19 }
  0xc4   : > { %935 = vrot.lane.b32.xlu0 %v2263_v32, %s1807_s28 }
  0xc5   : > { %v976_v22 = vpop.permute.xlu1 %975 }
  0xc6   : > { %v962_v34 = vpop.permute.xlu0 %961  ;;  %v1240_v24 = vsel %vm1222_vm14, %v1207_v31, %v976_v22 }
  0xc7   : > { %v1226_v12 = vsel %vm1222_vm14, %v1193_v17, %v962_v34  ;;  %921 = vrot.lane.b32.xlu1 %v2331_v58, %s1806_s25  ;;  %1720 = vmatprep.mubr.msk.bf16.mxu1 %vm1277_vm15, %v1240_v24 }
  0xc8   : > { %937 = vrot.lane.b32.xlu0 %v2375_v27, %s1807_s28  ;;  %1705 = vmatmul.mubr.msk.bf16.vlgmr.msra.gmra.mrb[0].mxu0 %vm1277_vm15, %v1226_v12 }
  0xc9   : > { %v2390_v14 = vpop.permute.xlu1 %659 }
  0xca   : > { %v2394_v11 = vpop.permute.xlu0 %645 }
  0xcb   : > { %951 = vrot.lane.b32.xlu1 %v2281_v16, %s1807_s28 }
  0xcc   : > { %967 = vrot.lane.b32.xlu0 %v2284_v43, %s1808_s4 }
  0xcd   : > { %v978_v20 = vpop.permute.xlu1 %977 }
  0xce   : > { %v2408_v21 = vpop.permute.xlu0 %754  ;;  %v1242_v54 = vsel %vm1222_vm14, %v1209_v3, %v978_v20 }
  0xcf   : > { %953 = vrot.lane.b32.xlu1 %v638_v7, %s1807_s28  ;;  %1721 = vmatmul.mubr.msk.bf16.vlgmr.msra.gmra.mrb[0].mxu1 %vm1277_vm15, %v1242_v54 }
  0xd0   : > { %651 = vrot.lane.b32.xlu0 %v2263_v32, %s1801_s16  ;;  %v270_v32 = vpack.c.bf16 %v254_v55, %v253_v9  ;;  %v997_v55 = vsel %vm991_vm7, %v1908_v46, %v2353_v50 }
  0xd1   : > { %v2415_v33 = vpop.permute.xlu1 %661 }
  0xd2   : > { %v2418_v53 = vpop.permute.xlu0 %756  ;;  %v377_v41 = vshrl.u32 %v270_v32, 16  ;;  %v380_v31 = vshll.u32 %v270_v32, 16 }
  0xd3   : > { %983 = vrot.lane.b32.xlu1 %v2322_v39, %s1808_s4 }
  0xd4   : > { %969 = vrot.lane.b32.xlu0 %v725_v18, %s1808_s4  ;;  %v379_v37 = vrot.slane %v377_v41, 7 }
  0xd5   : > { %v2427_v56 = vpop.permute.xlu1 %770 }
  0xd6   : > { %v788_v62 = vpop.permute.xlu0 %787  ;;  %v382_v15 = vor.u32 %v380_v31, %v379_v37  ;;  %v449_v2 = vsel %vm1876_vm2, %v379_v37, 0 }
  0xd7   : > { %667 = vrot.lane.b32.xlu1 %v2281_v16, %s1801_s16  ;;  %v823_v47 = vshll.u32 %v449_v2, 16  ;;  %v861_v19 = vrot.slane %v449_v2, 1 }
  0xd8   : > { %653 = vrot.lane.b32.xlu0 %v2375_v27, %s1801_s16  ;;  %v433_v34 = vsel %vm1876_vm2, 0, %v382_v15 }
  0xd9   : > { %v2434_v38 = vpop.permute.xlu1 %772  ;;  %v818_v12 = vshll.u32 %v433_v34, 16  ;;  %v816_v25 = vshrl.u32 %v433_v34, 16  ;;  %v825_v26 = vrot.slane %v823_v47, 1  ;;  %v860_v44 = vrot.slane %v433_v34, 1 }
  0xda   : > { %v2436_v5 = vpop.permute.xlu0 %789 }
  0xdb   : > { %985 = vrot.lane.b32.xlu1 %v749_v51, %s1808_s4  ;;  %v820_v35 = vrot.slane %v818_v12, 1  ;;  %v862_v46 = vsel %vm702_vm3, %v860_v44, %v861_v19 }
  0xdc   : > { %762 = vrot.lane.b32.xlu0 %v2284_v43, %s1802_s21 }
  0xdd   : > { %v2441_v23 = vpop.permute.xlu1 %803  ;;  %v821_v20 = vor.u32 %v820_v35, %v816_v25 }
  0xde   : > { %v832_v16 = vpop.permute.xlu0 %831 }
  0xdf   : > { %669 = vrot.lane.b32.xlu1 %v638_v7, %s1801_s16 }
  0xe0   : > { %764 = vrot.lane.b32.xlu0 %v725_v18, %s1802_s21 }
  0xe1   : > { %v2445_v22 = vpop.permute.xlu1 %805 }
  0xe2   : > { %v834_v17 = vpop.permute.xlu0 %833 }
  0xe3   : > { %778 = vrot.lane.b32.xlu1 %v2322_v39, %s1802_s21 }
  0xe4   : > { %795 = vrot.lane.b32.xlu0 %v2288_v61, %s1803_s22 }
  0xe5   : > { %v848_v43 = vpop.permute.xlu1 %847 }
  0xe6   : > { %v868_v24 = vpop.permute.xlu0 %867 }
  0xe7   : > { %780 = vrot.lane.b32.xlu1 %v749_v51, %s1802_s21 }
  0xe8   : > { %797 = vrot.lane.b32.xlu0 %v1912_v49, %s1803_s22 }
  0xe9   : > { %v2456_v6 = vpop.permute.xlu1 %849 }
  0xea   : > { %v870_v39 = vpop.permute.xlu0 %869 }
  0xeb   : > { %811 = vrot.lane.b32.xlu1 %v2331_v58, %s1803_s22 }
  0xec   : > { %839 = vrot.lane.b32.xlu0 %v2375_v27, %s1804_s23  ;;  %v826_v27 = vsel %vm450_vm4, %v821_v20, %v825_v26 }
  0xed   : > { %v884_v8 = vpop.permute.xlu1 %883 }
  0xee   : > { %v900_v3 = vpop.permute.xlu0 %899 }
  0xef   : > { %813 = vrot.lane.b32.xlu1 %v433_v34, %s1803_s22 }
  0xf0   : > { %841 = vrot.lane.b32.xlu0 %v1942_v13, %s1804_s23 }
  0xf1   : > { %v886_v10 = vpop.permute.xlu1 %885 }
  0xf2   : > { %v902_v48 = vpop.permute.xlu0 %901 }
  0xf3   : > { %855 = vrot.lane.b32.xlu1 %v638_v7, %s1804_s23  ;;  %v1030_v7 = vsel %vm1024_vm8, %v997_v55, %v2408_v21  ;;  %v999_v21 = vsel %vm991_vm7, %v1981_v52, %v2394_v11 }
  0xf4   : > { %875 = vrot.lane.b32.xlu0 %v725_v18, %s1805_s24  ;;  %v1063_v18 = vsel %vm1057_vm9, %v1030_v7, %v788_v62  ;;  %v1032_v52 = vsel %vm1024_vm8, %v999_v21, %v2418_v53 }
  0xf5   : > { %v916_v54 = vpop.permute.xlu1 %915  ;;  %v1096_v37 = vsel %vm1090_vm10, %v1063_v18, %v832_v16 }
  0xf6   : > { %v932_v9 = vpop.permute.xlu0 %931  ;;  %v1129_v31 = vsel %vm1123_vm11, %v1096_v37, %v868_v24 }
  0xf7   : > { %857 = vrot.lane.b32.xlu1 %v826_v27, %s1804_s23  ;;  %v1162_v50 = vsel %vm1156_vm12, %v1129_v31, %v900_v3 }
  0xf8   : > { %877 = vrot.lane.b32.xlu0 %v1926_v60, %s1805_s24  ;;  %v1195_v62 = vsel %vm1189_vm13, %v1162_v50, %v932_v9 }
  0xf9   : > { %v918_v32 = vpop.permute.xlu1 %917 }
  0xfa   : > { %v934_v41 = vpop.permute.xlu0 %933 }
  0xfb   : > { %891 = vrot.lane.b32.xlu1 %v749_v51, %s1805_s24  ;;  %v1013_v51 = vsel %vm991_vm7, %v1901_v42, %v2390_v14  ;;  %v1065_v42 = vsel %vm1057_vm9, %v1032_v52, %v2436_v5 }
  0xfc   : > { %907 = vrot.lane.b32.xlu0 %v1912_v49, %s1806_s25  ;;  %v1046_v49 = vsel %vm1024_vm8, %v1013_v51, %v2427_v56  ;;  %v1098_v56 = vsel %vm1090_vm10, %v1065_v42, %v834_v17 }
  0xfd   : > { %v948_v15 = vpop.permute.xlu1 %947  ;;  %v1079_v11 = vsel %vm1057_vm9, %v1046_v49, %v2441_v23 }
  0xfe   : > { %v964_v12 = vpop.permute.xlu0 %963  ;;  %v1112_v14 = vsel %vm1090_vm10, %v1079_v11, %v848_v43 }
  0xff   : > { %v1228_v16 = vsel %vm1222_vm14, %v1195_v62, %v964_v12  ;;  %893 = vrot.lane.b32.xlu1 %v862_v46, %s1805_s24  ;;  %v1145_v25 = vsel %vm1123_vm11, %v1112_v14, %v884_v8 }
 0x100   : > { %909 = vrot.lane.b32.xlu0 %v1887_v36, %s1806_s25  ;;  %1708 = vmatprep.mubr.msk.bf16.mxu0 %vm1277_vm15, %v1228_v16  ;;  %v1131_v36 = vsel %vm1123_vm11, %v1098_v56, %v870_v39  ;;  %v1178_v53 = vsel %vm1156_vm12, %v1145_v25, %v916_v54 }
 0x101   : > { %v950_v24 = vpop.permute.xlu1 %949  ;;  %v1164_v23 = vsel %vm1156_vm12, %v1131_v36, %v902_v48  ;;  %v1211_v5 = vsel %vm1189_vm13, %v1178_v53, %v948_v15 }
 0x102   : > { %v648_v2 = vpop.permute.xlu0 %647  ;;  %v1197_v43 = vsel %vm1189_vm13, %v1164_v23, %v934_v41 }
 0x103   : > { %923 = vrot.lane.b32.xlu1 %v433_v34, %s1806_s25  ;;  %v1015_v34 = vsel %vm991_vm7, %v2001_v63, %v2415_v33  ;;  %v1001_v21 = vsel %vm991_vm7, %v2062_v45, %v648_v2 }
 0x104   : > { %939 = vrot.lane.b32.xlu0 %v1942_v13, %s1807_s28  ;;  %v1048_v13 = vsel %vm1024_vm8, %v1015_v34, %v2434_v38 }
 0x105   : > { %v980_v35 = vpop.permute.xlu1 %979  ;;  %v1081_v8 = vsel %vm1057_vm9, %v1048_v13, %v2445_v22 }
 0x106   : > { %v966_v47 = vpop.permute.xlu0 %965  ;;  %v1244_v17 = vsel %vm1222_vm14, %v1211_v5, %v980_v35  ;;  %v1114_v63 = vsel %vm1090_vm10, %v1081_v8, %v2456_v6 }
 0x107   : > { %v1230_v39 = vsel %vm1222_vm14, %v1197_v43, %v966_v47  ;;  %925 = vrot.lane.b32.xlu1 %v1800_v0, %s1806_s25  ;;  %1724 = vmatprep.mubr.msk.bf16.mxu1 %vm1277_vm15, %v1244_v17  ;;  %v1147_v0 = vsel %vm1123_vm11, %v1114_v63, %v886_v10 }
 0x108   : > { %941 = vrot.lane.b32.xlu0 %v1959_v30, %s1807_s28  ;;  %1709 = vmatmul.mubr.msk.bf16.gmra.mrb[4].mxu0 %vm1277_vm15, %v1230_v39  ;;  %v1180_v20 = vsel %vm1156_vm12, %v1147_v0, %v918_v32 }
 0x109   : > { %v664_v3 = vpop.permute.xlu1 %663  ;;  %v1213_v30 = vsel %vm1189_vm13, %v1180_v20, %v950_v24 }
 0x10a   : > { %v650_v33 = vpop.permute.xlu0 %649  ;;  %v1017_v45 = vsel %vm991_vm7, %v2080_v57, %v664_v3 }
 0x10b   : > { %955 = vrot.lane.b32.xlu1 %v826_v27, %s1807_s28  ;;  %v1003_v24 = vsel %vm991_vm7, %v2112_v29, %v650_v33 }
 0x10c   : > { %971 = vrot.lane.b32.xlu0 %v1926_v60, %s1808_s4 }
 0x10d   : > { %v982_v38 = vpop.permute.xlu1 %981 }
 0x10e   : > { %v759_v26 = vpop.permute.xlu0 %758  ;;  %v1246_v22 = vsel %vm1222_vm14, %v1213_v30, %v982_v38 }
 0x10f   : > { %957 = vrot.lane.b32.xlu1 %v1849_v1, %s1807_s28  ;;  %1725 = vmatmul.mubr.msk.bf16.gmra.mrb[4].mxu1 %vm1277_vm15, %v1246_v22 }
 0x110   : > { %973 = vrot.lane.b32.xlu0 %v1935_v4, %s1808_s4 }
 0x111   : > { %v666_v6 = vpop.permute.xlu1 %665 }
 0x112   : > { %v761_v10 = vpop.permute.xlu0 %760  ;;  %v1019_v63 = vsel %vm991_vm7, %v2131_v40, %v666_v6 }
 0x113   : > { %987 = vrot.lane.b32.xlu1 %v862_v46, %s1808_s4  ;;  %v1036_v25 = vsel %vm1024_vm8, %v1003_v24, %v761_v10 }
 0x115   : > { %v775_v48 = vpop.permute.xlu1 %774 }
 0x116   : > { %v792_v60 = vpop.permute.xlu0 %791  ;;  %v1050_v56 = vsel %vm1024_vm8, %v1017_v45, %v775_v48 }
 0x117   : > { %989 = vrot.lane.b32.xlu1 %v1849_v1, %s1808_s4  ;;  %v1034_v1 = vsel %vm1024_vm8, %v1001_v21, %v759_v26 }
 0x118   : > { %v1067_v12 = vsel %vm1057_vm9, %v1034_v1, %v792_v60 }
 0x119   : > { %v777_v27 = vpop.permute.xlu1 %776 }
 0x11a   : > { %v794_v54 = vpop.permute.xlu0 %793  ;;  %v1052_v0 = vsel %vm1024_vm8, %v1019_v63, %v777_v27 }
 0x11b   : > { %v1069_v23 = vsel %vm1057_vm9, %v1036_v25, %v794_v54 }
 0x11d   : > { %v808_v9 = vpop.permute.xlu1 %807 }
 0x11e   : > { %v836_v55 = vpop.permute.xlu0 %835  ;;  %v1083_v36 = vsel %vm1057_vm9, %v1050_v56, %v808_v9 }
 0x11f   : > { %v1100_v16 = vsel %vm1090_vm10, %v1067_v12, %v836_v55 }
 0x121   : > { %v810_v44 = vpop.permute.xlu1 %809 }
 0x122   : > { %v838_v19 = vpop.permute.xlu0 %837  ;;  %v1085_v20 = vsel %vm1057_vm9, %v1052_v0, %v810_v44 }
 0x123   : > { %v1102_v35 = vsel %vm1090_vm10, %v1069_v23, %v838_v19 }
 0x125   : > { %v852_v7 = vpop.permute.xlu1 %851 }
 0x126   : > { %v872_v32 = vpop.permute.xlu0 %871  ;;  %v1116_v29 = vsel %vm1090_vm10, %v1083_v36, %v852_v7 }
 0x127   : > { %v1133_v49 = vsel %vm1123_vm11, %v1100_v16, %v872_v32 }
 0x129   : > { %v854_v18 = vpop.permute.xlu1 %853 }
 0x12a   : > { %v874_v41 = vpop.permute.xlu0 %873  ;;  %v1118_v38 = vsel %vm1090_vm10, %v1085_v20, %v854_v18 }
 0x12b   : > { %v1135_v43 = vsel %vm1123_vm11, %v1102_v35, %v874_v41 }
 0x12d   : > { %v888_v4 = vpop.permute.xlu1 %887 }
 0x12e   : > { %v904_v37 = vpop.permute.xlu0 %903  ;;  %v1149_v57 = vsel %vm1123_vm11, %v1116_v29, %v888_v4 }
 0x12f   : > { %v1166_v52 = vsel %vm1156_vm12, %v1133_v49, %v904_v37 }
 0x131   : > { %v890_v31 = vpop.permute.xlu1 %889 }
 0x132   : > { %v906_v50 = vpop.permute.xlu0 %905  ;;  %v1151_v22 = vsel %vm1123_vm11, %v1118_v38, %v890_v31 }
 0x133   : > { %v1168_v17 = vsel %vm1156_vm12, %v1135_v43, %v906_v50 }
 0x135   : > { %v920_v46 = vpop.permute.xlu1 %919 }
 0x136   : > { %v936_v15 = vpop.permute.xlu0 %935  ;;  %v1182_v47 = vsel %vm1156_vm12, %v1149_v57, %v920_v46 }
 0x137   : > { %v1199_v42 = vsel %vm1189_vm13, %v1166_v52, %v936_v15 }
 0x139   : > { %v922_v62 = vpop.permute.xlu1 %921 }
 0x13a   : > { %v938_v51 = vpop.permute.xlu0 %937  ;;  %v1184_v10 = vsel %vm1156_vm12, %v1151_v22, %v922_v62 }
 0x13b   : > { %v1201_v13 = vsel %vm1189_vm13, %v1168_v17, %v938_v51 }
 0x13d   : > { %v952_v11 = vpop.permute.xlu1 %951 }
 0x13e   : > { %v968_v14 = vpop.permute.xlu0 %967  ;;  %v1215_v34 = vsel %vm1189_vm13, %v1182_v47, %v952_v11 }
 0x13f   : > { %v1232_v2 = vsel %vm1222_vm14, %v1199_v42, %v968_v14 }
 0x140   : > { %1712 = vmatprep.mubr.msk.bf16.mxu0 %vm1277_vm15, %v1232_v2 }
 0x141   : > { %v954_v53 = vpop.permute.xlu1 %953 }
 0x142   : > { %v652_v5 = vpop.permute.xlu0 %651  ;;  %v1217_v40 = vsel %vm1189_vm13, %v1184_v10, %v954_v53 }
 0x143   : > { %v1005_v51 = vsel %vm991_vm7, %v2211_v28, %v652_v5 }
 0x145   : > { %v984_v39 = vpop.permute.xlu1 %983 }
 0x146   : > { %v970_v8 = vpop.permute.xlu0 %969  ;;  %v1248_v3 = vsel %vm1222_vm14, %v1215_v34, %v984_v39 }
 0x147   : > { %v1234_v33 = vsel %vm1222_vm14, %v1201_v13, %v970_v8  ;;  %1728 = vmatprep.mubr.msk.bf16.mxu1 %vm1277_vm15, %v1248_v3 }
 0x148   : > { %1713 = vmatmul.mubr.msk.bf16.gmra.mrb[8].mxu0 %vm1277_vm15, %v1234_v33 }
 0x149   : > { %v668_v30 = vpop.permute.xlu1 %667 }
 0x14a   : > { %v654_v26 = vpop.permute.xlu0 %653 }
 0x14b   : > { %v1007_v52 = vsel %vm991_vm7, %v2288_v61, %v654_v26  ;;  %v1021_v61 = vsel %vm991_vm7, %v2235_v59, %v668_v30 }
 0x14d   : > { %v986_v6 = vpop.permute.xlu1 %985 }
 0x14e   : > { %v763_v48 = vpop.permute.xlu0 %762  ;;  %v1250_v60 = vsel %vm1222_vm14, %v1217_v40, %v986_v6  ;;  %v2632_v40 = vld [vmem:[%s2748_s2] ss:$0 sm:$0xff] }
 0x14f   : > { %1729 = vmatmul.mubr.msk.bf16.gmra.mrb[8].mxu1 %vm1277_vm15, %v1250_v60  ;;  %v1038_v16 = vsel %vm1024_vm8, %v1005_v51, %v763_v48 }
 0x151   : > { %v670_v27 = vpop.permute.xlu1 %669 }
 0x152   : > { %v765_v54 = vpop.permute.xlu0 %764  ;;  %v1023_v34 = vsel %vm991_vm7, %v2331_v58, %v670_v27 }
 0x153   : > { %v1040_v45 = vsel %vm1024_vm8, %v1007_v52, %v765_v54 }
 0x155   : > { %v779_v9 = vpop.permute.xlu1 %778 }
 0x156   : > { %v796_v55 = vpop.permute.xlu0 %795  ;;  %v1054_v29 = vsel %vm1024_vm8, %v1021_v61, %v779_v9 }
 0x157   : > { %v1071_v11 = vsel %vm1057_vm9, %v1038_v16, %v796_v55 }
 0x159   : > { %v781_v44 = vpop.permute.xlu1 %780 }
 0x15a   : > { %v798_v19 = vpop.permute.xlu0 %797  ;;  %v1056_v8 = vsel %vm1024_vm8, %v1023_v34, %v781_v44 }
 0x15b   : > { %v1073_v28 = vsel %vm1057_vm9, %v1040_v45, %v798_v19 }
 0x15d   : > { %v812_v7 = vpop.permute.xlu1 %811 }
 0x15e   : > { %v840_v32 = vpop.permute.xlu0 %839  ;;  %v1087_v35 = vsel %vm1057_vm9, %v1054_v29, %v812_v7 }
 0x15f   : > { %v1104_v42 = vsel %vm1090_vm10, %v1071_v11, %v840_v32 }
 0x161   : > { %v814_v18 = vpop.permute.xlu1 %813 }
 0x162   : > { %v842_v41 = vpop.permute.xlu0 %841  ;;  %v1089_v63 = vsel %vm1057_vm9, %v1056_v8, %v814_v18 }
 0x163   : > { %v1106_v53 = vsel %vm1090_vm10, %v1073_v28, %v842_v41 }
 0x165   : > { %v856_v4 = vpop.permute.xlu1 %855 }
 0x166   : > { %v876_v37 = vpop.permute.xlu0 %875  ;;  %v1120_v47 = vsel %vm1090_vm10, %v1087_v35, %v856_v4 }
 0x167   : > { %v1137_v14 = vsel %vm1123_vm11, %v1104_v42, %v876_v37 }
 0x169   : > { %v858_v31 = vpop.permute.xlu1 %857 }
 0x16a   : > { %v878_v50 = vpop.permute.xlu0 %877  ;;  %v1122_v20 = vsel %vm1090_vm10, %v1089_v63, %v858_v31 }
 0x16b   : > { %v1139_v5 = vsel %vm1123_vm11, %v1106_v53, %v878_v50 }
 0x16d   : > { %v892_v46 = vpop.permute.xlu1 %891 }
 0x16e   : > { %v908_v15 = vpop.permute.xlu0 %907  ;;  %v1153_v39 = vsel %vm1123_vm11, %v1120_v47, %v892_v46 }
 0x16f   : > { %v1170_v2 = vsel %vm1156_vm12, %v1137_v14, %v908_v15 }
 0x171   : > { %v894_v21 = vpop.permute.xlu1 %893 }
 0x172   : > { %v910_v1 = vpop.permute.xlu0 %909  ;;  %v1155_v30 = vsel %vm1123_vm11, %v1122_v20, %v894_v21 }
 0x173   : > { %v1172_v57 = vsel %vm1156_vm12, %v1139_v5, %v910_v1 }
 0x175   : > { %v924_v62 = vpop.permute.xlu1 %923 }
 0x176   : > { %v940_v12 = vpop.permute.xlu0 %939  ;;  %v1186_v3 = vsel %vm1156_vm12, %v1153_v39, %v924_v62 }
 0x177   : > { %v1203_v25 = vsel %vm1189_vm13, %v1170_v2, %v940_v12 }
 0x179   : > { %v926_v49 = vpop.permute.xlu1 %925 }
 0x17a   : > { %v942_v24 = vpop.permute.xlu0 %941  ;;  %v1188_v38 = vsel %vm1156_vm12, %v1155_v30, %v926_v49 }
 0x17b   : > { %v1205_v17 = vsel %vm1189_vm13, %v1172_v57, %v942_v24 }
 0x17d   : > { %v956_v56 = vpop.permute.xlu1 %955 }
 0x17e   : > { %v972_v36 = vpop.permute.xlu0 %971  ;;  %v1219_v33 = vsel %vm1189_vm13, %v1186_v3, %v956_v56 }
 0x17f   : > { %v1236_v23 = vsel %vm1222_vm14, %v1203_v25, %v972_v36 }
 0x180   : > { %1716 = vmatprep.mubr.msk.bf16.mxu0 %vm1277_vm15, %v1236_v23 }
 0x181   : > { %v958_v43 = vpop.permute.xlu1 %957 }
 0x182   : > { %v974_v59 = vpop.permute.xlu0 %973  ;;  %v1221_v26 = vsel %vm1189_vm13, %v1188_v38, %v958_v43 }
 0x183   : > { %v1238_v13 = vsel %vm1222_vm14, %v1205_v17, %v974_v59 }
 0x184   : > { %1717 = vmatmul.mubr.msk.bf16.gmra.mrb[12].mxu0 %vm1277_vm15, %v1238_v13 }
 0x185   : > { %v988_v0 = vpop.permute.xlu1 %987 }
 0x186   : > { %v1252_v58 = vsel %vm1222_vm14, %v1219_v33, %v988_v0 }
 0x187   : > { %1732 = vmatprep.mubr.msk.bf16.mxu1 %vm1277_vm15, %v1252_v58 }
 0x189   : > { %v990_v22 = vpop.permute.xlu1 %989 }
 0x18a   : > { %v1254_v10 = vsel %vm1222_vm14, %v1221_v26, %v990_v22 }
 0x18b   : > { %1733 = vmatmul.mubr.msk.bf16.gmra.mrb[12].mxu1 %vm1277_vm15, %v1254_v10 }
 0x19b   : > { %v1706_v6 = vpop.f32.mrb[0].mxu0 }
 0x19c   : > { %v1360_v48 = vadd.f32 %v1706_v6, %v2632_v40  ;;  %v1351_v60 = vpop.f32.mrb[1].mxu0 }
 0x19d   : > { %v1352_v27 = vadd.f32 %v2632_v40, %v1351_v60  ;;  %v1707_v54 = vpop.f32.mrb[2].mxu0 }
 0x19e   : > { %v1480_v9 = vmax.f32 %v1360_v48, 0.0  ;;  %v1363_v55 = vadd.f32 %v1707_v54, %v2632_v40  ;;  %v1354_v44 = vpop.f32.mrb[3].mxu0 }
 0x19f   : > { %v1478_v19 = vmax.f32 %v1352_v27, 0.0  ;;  %v1355_v7 = vadd.f32 %v2632_v40, %v1354_v44 }
 0x1a0   : > { %1513 = vst.msk [vmem:[%s2640_s9 + $0x10] sm:$0xff] %vm1510_vm0, %v1480_v9  ;;  %v1481_v32 = vmax.f32 %v1363_v55, 0.0 }
 0x1a1   : > { %1511 = vst.msk [vmem:[%s2640_s9] sm:$0xff] %vm1510_vm0, %v1478_v19  ;;  %v1479_v18 = vmax.f32 %v1355_v7, 0.0 }
 0x1a2   : > { %1514 = vst.msk [vmem:[%s2640_s9 + $0x18] sm:$0xff] %vm1510_vm0, %v1481_v32  ;;  %v1722_v41 = vpop.f32.mrb[0].mxu1 }
 0x1a3   : > { %1512 = vst.msk [vmem:[%s2640_s9 + $0x8] sm:$0xff] %vm1510_vm0, %v1479_v18  ;;  %v1424_v4 = vadd.f32 %v1722_v41, %v2632_v40  ;;  %v1415_v37 = vpop.f32.mrb[1].mxu1 }
 0x1a4   : > { %v1416_v31 = vadd.f32 %v2632_v40, %v1415_v37  ;;  %v1723_v50 = vpop.f32.mrb[2].mxu1 }
 0x1a5   : > { %v1496_v46 = vmax.f32 %v1424_v4, 0.0  ;;  %v1427_v15 = vadd.f32 %v1723_v50, %v2632_v40  ;;  %v1418_v21 = vpop.f32.mrb[3].mxu1 }
 0x1a6   : > { %v1494_v1 = vmax.f32 %v1416_v31, 0.0  ;;  %v1419_v62 = vadd.f32 %v2632_v40, %v1418_v21 }
 0x1a7   : > { %1529 = vst.msk [vmem:[%s2640_s9 + $0x90] sm:$0xff] %vm1510_vm0, %v1496_v46  ;;  %v1497_v12 = vmax.f32 %v1427_v15, 0.0 }
 0x1a8   : > { %1527 = vst.msk [vmem:[%s2640_s9 + $0x80] sm:$0xff] %vm1510_vm0, %v1494_v1  ;;  %v1495_v51 = vmax.f32 %v1419_v62, 0.0 }
 0x1a9   : > { %1530 = vst.msk [vmem:[%s2640_s9 + $0x98] sm:$0xff] %vm1510_vm0, %v1497_v12 }
 0x1aa   : > { %1528 = vst.msk [vmem:[%s2640_s9 + $0x88] sm:$0xff] %vm1510_vm0, %v1495_v51 }
 0x1db   : > { %v1710_v16 = vpop.f32.mrb[4].mxu0 }
 0x1dc   : > { %v1376_v49 = vadd.f32 %v1710_v16, %v2632_v40  ;;  %v1367_v52 = vpop.f32.mrb[5].mxu0 }
 0x1dd   : > { %v1368_v11 = vadd.f32 %v2632_v40, %v1367_v52  ;;  %v1711_v24 = vpop.f32.mrb[6].mxu0 }
 0x1de   : > { %v1484_v42 = vmax.f32 %v1376_v49, 0.0  ;;  %v1379_v14 = vadd.f32 %v1711_v24, %v2632_v40  ;;  %v1370_v45 = vpop.f32.mrb[7].mxu0 }
 0x1df   : > { %v1482_v2 = vmax.f32 %v1368_v11, 0.0  ;;  %v1371_v56 = vadd.f32 %v2632_v40, %v1370_v45 }
 0x1e0   : > { %1517 = vst.msk [vmem:[%s2640_s9 + $0x30] sm:$0xff] %vm1510_vm0, %v1484_v42  ;;  %v1485_v28 = vmax.f32 %v1379_v14, 0.0 }
 0x1e1   : > { %1515 = vst.msk [vmem:[%s2640_s9 + $0x20] sm:$0xff] %vm1510_vm0, %v1482_v2  ;;  %v1483_v25 = vmax.f32 %v1371_v56, 0.0 }
 0x1e2   : > { %1518 = vst.msk [vmem:[%s2640_s9 + $0x38] sm:$0xff] %vm1510_vm0, %v1485_v28  ;;  %v1726_v36 = vpop.f32.mrb[4].mxu1 }
 0x1e3   : > { %1516 = vst.msk [vmem:[%s2640_s9 + $0x28] sm:$0xff] %vm1510_vm0, %v1483_v25  ;;  %v1440_v61 = vadd.f32 %v1726_v36, %v2632_v40  ;;  %v1431_v53 = vpop.f32.mrb[5].mxu1 }
 0x1e4   : > { %v1432_v23 = vadd.f32 %v2632_v40, %v1431_v53  ;;  %v1727_v29 = vpop.f32.mrb[6].mxu1 }
 0x1e5   : > { %v1500_v5 = vmax.f32 %v1440_v61, 0.0  ;;  %v1443_v35 = vadd.f32 %v1727_v29, %v2632_v40  ;;  %v1434_v57 = vpop.f32.mrb[7].mxu1 }
 0x1e6   : > { %v1498_v43 = vmax.f32 %v1432_v23, 0.0  ;;  %v1435_v47 = vadd.f32 %v2632_v40, %v1434_v57 }
 0x1e7   : > { %1533 = vst.msk [vmem:[%s2640_s9 + $0xb0] sm:$0xff] %vm1510_vm0, %v1500_v5  ;;  %v1501_v17 = vmax.f32 %v1443_v35, 0.0 }
 0x1e8   : > { %1531 = vst.msk [vmem:[%s2640_s9 + $0xa0] sm:$0xff] %vm1510_vm0, %v1498_v43  ;;  %v1499_v59 = vmax.f32 %v1435_v47, 0.0 }
 0x1e9   : > { %1534 = vst.msk [vmem:[%s2640_s9 + $0xb8] sm:$0xff] %vm1510_vm0, %v1501_v17 }
 0x1ea   : > { %1532 = vst.msk [vmem:[%s2640_s9 + $0xa8] sm:$0xff] %vm1510_vm0, %v1499_v59 }
 0x21b   : > { %v1714_v34 = vpop.f32.mrb[8].mxu0 }
 0x21c   : > { %v1392_v39 = vadd.f32 %v1714_v34, %v2632_v40  ;;  %v1383_v13 = vpop.f32.mrb[9].mxu0 }
 0x21d   : > { %v1384_v8 = vadd.f32 %v2632_v40, %v1383_v13  ;;  %v1715_v3 = vpop.f32.mrb[10].mxu0 }
 0x21e   : > { %v1488_v63 = vmax.f32 %v1392_v39, 0.0  ;;  %v1395_v33 = vadd.f32 %v1715_v3, %v2632_v40  ;;  %v1386_v0 = vpop.f32.mrb[11].mxu0 }
 0x21f   : > { %v1486_v20 = vmax.f32 %v1384_v8, 0.0  ;;  %v1387_v58 = vadd.f32 %v2632_v40, %v1386_v0 }
 0x220   : > { %1521 = vst.msk [vmem:[%s2640_s9 + $0x50] sm:$0xff] %vm1510_vm0, %v1488_v63  ;;  %v1489_v30 = vmax.f32 %v1395_v33, 0.0 }
 0x221   : > { %1519 = vst.msk [vmem:[%s2640_s9 + $0x40] sm:$0xff] %vm1510_vm0, %v1486_v20  ;;  %v1487_v38 = vmax.f32 %v1387_v58, 0.0 }
 0x222   : > { %1522 = vst.msk [vmem:[%s2640_s9 + $0x58] sm:$0xff] %vm1510_vm0, %v1489_v30  ;;  %v1730_v26 = vpop.f32.mrb[8].mxu1 }
 0x223   : > { %1520 = vst.msk [vmem:[%s2640_s9 + $0x48] sm:$0xff] %vm1510_vm0, %v1487_v38  ;;  %v1456_v22 = vadd.f32 %v1730_v26, %v2632_v40  ;;  %v1447_v10 = vpop.f32.mrb[9].mxu1 }
 0x224   : > { %v1448_v6 = vadd.f32 %v2632_v40, %v1447_v10  ;;  %v1731_v48 = vpop.f32.mrb[10].mxu1 }
 0x225   : > { %v1504_v60 = vmax.f32 %v1456_v22, 0.0  ;;  %v1459_v27 = vadd.f32 %v1731_v48, %v2632_v40  ;;  %v1450_v54 = vpop.f32.mrb[11].mxu1 }
 0x226   : > { %v1502_v9 = vmax.f32 %v1448_v6, 0.0  ;;  %v1451_v55 = vadd.f32 %v2632_v40, %v1450_v54 }
 0x227   : > { %1537 = vst.msk [vmem:[%s2640_s9 + $0xd0] sm:$0xff] %vm1510_vm0, %v1504_v60  ;;  %v1505_v44 = vmax.f32 %v1459_v27, 0.0 }
 0x228   : > { %1535 = vst.msk [vmem:[%s2640_s9 + $0xc0] sm:$0xff] %vm1510_vm0, %v1502_v9  ;;  %v1503_v19 = vmax.f32 %v1451_v55, 0.0 }
 0x229   : > { %1538 = vst.msk [vmem:[%s2640_s9 + $0xd8] sm:$0xff] %vm1510_vm0, %v1505_v44 }
 0x22a   : > { %1536 = vst.msk [vmem:[%s2640_s9 + $0xc8] sm:$0xff] %vm1510_vm0, %v1503_v19 }
 0x257   : > { %v1718_v7 = vpop.f32.mrb[12].mxu0 }
 0x258   : > { %v1408_v32 = vadd.f32 %v1718_v7, %v2632_v40  ;;  %v1399_v18 = vpop.f32.mrb[13].mxu0 }
 0x259   : > { %v1400_v41 = vadd.f32 %v2632_v40, %v1399_v18  ;;  %v1719_v4 = vpop.f32.mrb[14].mxu0 }
 0x25a   : > { %v1492_v37 = vmax.f32 %v1408_v32, 0.0  ;;  %v1411_v31 = vadd.f32 %v1719_v4, %v2632_v40  ;;  %v1402_v50 = vpop.f32.mrb[15].mxu0 }
 0x25b   : > { %v1490_v46 = vmax.f32 %v1400_v41, 0.0  ;;  %v1403_v15 = vadd.f32 %v2632_v40, %v1402_v50 }
 0x25c   : > { %1525 = vst.msk [vmem:[%s2640_s9 + $0x70] sm:$0xff] %vm1510_vm0, %v1492_v37  ;;  %v1493_v21 = vmax.f32 %v1411_v31, 0.0 }
 0x25d   : > { %1523 = vst.msk [vmem:[%s2640_s9 + $0x60] sm:$0xff] %vm1510_vm0, %v1490_v46  ;;  %v1491_v1 = vmax.f32 %v1403_v15, 0.0 }
 0x25e   : > { %1526 = vst.msk [vmem:[%s2640_s9 + $0x78] sm:$0xff] %vm1510_vm0, %v1493_v21  ;;  %v1734_v62 = vpop.f32.mrb[12].mxu1 }
 0x25f   : > { %1524 = vst.msk [vmem:[%s2640_s9 + $0x68] sm:$0xff] %vm1510_vm0, %v1491_v1  ;;  %v1472_v12 = vadd.f32 %v1734_v62, %v2632_v40  ;;  %v1463_v51 = vpop.f32.mrb[13].mxu1 }
 0x260   : > { %v1464_v16 = vadd.f32 %v2632_v40, %v1463_v51  ;;  %v1735_v49 = vpop.f32.mrb[14].mxu1 }
 0x261   : > { %v1508_v52 = vmax.f32 %v1472_v12, 0.0  ;;  %v1475_v11 = vadd.f32 %v1735_v49, %v2632_v40  ;;  %v1466_v24 = vpop.f32.mrb[15].mxu1 }
 0x262   : > { %v1506_v42 = vmax.f32 %v1464_v16, 0.0  ;;  %v1467_v14 = vadd.f32 %v2632_v40, %v1466_v24 }
 0x263   : > { %1541 = vst.msk [vmem:[%s2640_s9 + $0xf0] sm:$0xff] %vm1510_vm0, %v1508_v52  ;;  %v1509_v45 = vmax.f32 %v1475_v11, 0.0 }
 0x264   : > { %1539 = vst.msk [vmem:[%s2640_s9 + $0xe0] sm:$0xff] %vm1510_vm0, %v1506_v42  ;;  %v1507_v2 = vmax.f32 %v1467_v14, 0.0 }
 0x265   : > { %1542 = vst.msk [vmem:[%s2640_s9 + $0xf8] sm:$0xff] %vm1510_vm0, %v1509_v45 }
 0x266   : > { %1540 = vst.msk [vmem:[%s2640_s9 + $0xe8] sm:$0xff] %vm1510_vm0, %v1507_v2 }
 0x267 PF: > { %s13_s14 = sadd.s32 1, %s1798_s14   ;;  %s2752_s12 = smov %s1794_s13 }
 0x268   : > { %p10_p5 = scmp.ge.s32.totalorder %s13_s14, 4   ;;  %s2753_s13 = smov %s2755_s15 }
 0x26a   :  { %12 = sbr.rel (!%p10_p5) target bundleno = 2 (0x2), region = 68 }

</bundles_post_ra>
